<compile_context>
chip_gen: v6e
topology: v6e:2x2x1
jax: 0.10.0
libtpu: 0.0.40
codegen_flags: <defaults>
</compile_context>

<pallas_src>
import functools

import jax
import jax.numpy as jnp
from jax.experimental import pallas as pl
from jax.experimental.pallas import tpu as pltpu


def _round_up(x, m):
    return (x + m - 1) // m * m


# ---------------------------------------------------------------------------
# Fused Pallas matmul kernel:  out = act(A @ B * scale + bias [+ residual])
# ---------------------------------------------------------------------------
def _matmul_kernel(a_ref, b_ref, s_ref, c_ref, *rest, act, has_residual):
    if has_residual:
        r_ref, o_ref = rest
    else:
        (o_ref,) = rest

    @pl.when(pl.program_id(2) == 0)
    def _():
        o_ref[...] = jnp.zeros_like(o_ref)

    # bf16 operands -> MXU, f32 accumulation directly in the f32 output block.
    o_ref[...] += jnp.dot(a_ref[...], b_ref[...],
                          preferred_element_type=jnp.float32)

    @pl.when(pl.program_id(2) == pl.num_programs(2) - 1)
    def _():
        y = o_ref[...] * s_ref[...] + c_ref[...]
        if has_residual:
            y = y + r_ref[...]
        if act == "relu":
            y = jnp.maximum(y, 0.0)
        elif act == "tanh":
            y = jnp.tanh(y)
        o_ref[...] = y


def matmul_fused(a, b, scale, bias, act="none", residual=None):
    """y[M,N] = act(a[M,K] @ b[K,N] * scale[N] + bias[N] (+ residual[M,N]))."""
    M, K = a.shape
    K2, N = b.shape
    assert K == K2

    mp16 = _round_up(M, 16)                    # bf16 sublane packing
    tm = mp16 if mp16 <= 512 else 256
    Mp = _round_up(M, tm)
    tk = min(512, _round_up(K, 128))           # do NOT over-pad K
    Kp = _round_up(K, tk)
    tn = min(512, _round_up(N, 128))           # lane-dense output
    Np = _round_up(N, tn)

    a_p = jnp.pad(a.astype(jnp.bfloat16), ((0, Mp - M), (0, Kp - K)))
    b_p = jnp.pad(b.astype(jnp.bfloat16), ((0, Kp - K), (0, Np - N)))
    s_p = jnp.pad(scale.astype(jnp.float32).reshape(1, N), ((0, 0), (0, Np - N)))
    c_p = jnp.pad(bias.astype(jnp.float32).reshape(1, N), ((0, 0), (0, Np - N)))

    in_specs = [
        pl.BlockSpec((tm, tk), lambda i, j, k: (i, k)),
        pl.BlockSpec((tk, tn), lambda i, j, k: (k, j)),
        pl.BlockSpec((1, tn), lambda i, j, k: (0, j)),
        pl.BlockSpec((1, tn), lambda i, j, k: (0, j)),
    ]
    operands = [a_p, b_p, s_p, c_p]
    has_residual = residual is not None
    if has_residual:
        r_p = jnp.pad(residual.astype(jnp.float32), ((0, Mp - M), (0, Np - N)))
        in_specs.append(pl.BlockSpec((tm, tn), lambda i, j, k: (i, j)))
        operands.append(r_p)

    grid = (Mp // tm, Np // tn, Kp // tk)
    out = pl.pallas_call(
        functools.partial(_matmul_kernel, act=act, has_residual=has_residual),
        out_shape=jax.ShapeDtypeStruct((Mp, Np), jnp.float32),
        grid_spec=pltpu.PrefetchScalarGridSpec(
            num_scalar_prefetch=0,
            grid=grid,
            in_specs=in_specs,
            out_specs=pl.BlockSpec((tm, tn), lambda i, j, k: (i, j)),
        ),
        compiler_params=pltpu.CompilerParams(
            dimension_semantics=("parallel", "parallel", "arbitrary")),
    )(*operands)
    return out[:M, :N]


# ---------------------------------------------------------------------------
# NHWC conv via im2col + fused Pallas matmul
# ---------------------------------------------------------------------------
def conv2d_nhwc(x, w_mat, cout, kh, kw, stride, padding, scale, bias, act,
                residual=None):
    """x:(B,H,W,Cin), w_mat:(kh*kw*Cin, cout) rows ordered (kh,kw,ci)."""
    B, H, W, Cin = x.shape
    OH = (H + 2 * padding - kh) // stride + 1
    OW = (W + 2 * padding - kw) // stride + 1
    xp = jnp.pad(x, ((0, 0), (padding, padding), (padding, padding), (0, 0)))
    cols = []
    for ih in range(kh):
        for iw in range(kw):
            cols.append(xp[:, ih:ih + stride * OH:stride,
                           iw:iw + stride * OW:stride, :])
    A = jnp.concatenate(cols, axis=-1).reshape(B * OH * OW, kh * kw * Cin)
    r = None if residual is None else residual.reshape(B * OH * OW, cout)
    y = matmul_fused(A, w_mat, scale, bias, act, residual=r)
    return y.reshape(B, OH, OW, cout)


def conv_transpose2d_s2(x, w_mat, cout, scale4, bias4, act):
    """ConvTranspose2d(k=4, s=2, p=1) as stride-1 3x3 conv (4*cout channels,
    weights pre-built in init) + pixel shuffle. No dilated/zero-inserted input."""
    B, H, W, _ = x.shape
    y = conv2d_nhwc(x, w_mat, 4 * cout, 3, 3, 1, 1, scale4, bias4, act)
    y = y.reshape(B, H, W, 2, 2, cout).transpose(0, 1, 3, 2, 4, 5)
    return y.reshape(B, 2 * H, 2 * W, cout)


# ---------------------------------------------------------------------------
# Weight transforms (done once at init)
# ---------------------------------------------------------------------------
def _conv_w_mat(w):
    """PyTorch Conv2d weight (Cout,Cin,KH,KW) -> (KH*KW*Cin, Cout)."""
    Cout, Cin, KH, KW = w.shape
    return w.transpose(2, 3, 1, 0).reshape(KH * KW * Cin, Cout)


def _deconv_s2_shuffle_w(w):
    """ConvTranspose2d(k=4,s=2,p=1) weight (Cin,Cout,4,4) -> equivalent
    stride-1 3x3 conv weight (3*3*Cin, 4*Cout); out columns ordered (r,s,co)
    where (r,s) is the output pixel parity (pixel-shuffle classes)."""
    Cin, Cout, _, _ = w.shape
    # (parity, window-tap) -> transposed-conv kernel index along that dim
    kmap = {(0, 0): 3, (0, 1): 1, (1, 1): 2, (1, 2): 0}
    wc = jnp.zeros((3, 3, Cin, 2, 2, Cout), w.dtype)
    for (r, th), kh in kmap.items():
        for (s, tw), kw in kmap.items():
            wc = wc.at[th, tw, :, r, s, :].set(w[:, :, kh, kw])
    return wc.reshape(3 * 3 * Cin, 4 * Cout)


def _bn_fold(num_features, eps=1e-5):
    """Eval-mode BN with init stats (gamma=1, beta=0, mean=0, var=1)."""
    gamma = jnp.ones((num_features,), jnp.float32)
    beta = jnp.zeros((num_features,), jnp.float32)
    mean = jnp.zeros((num_features,), jnp.float32)
    var = jnp.ones((num_features,), jnp.float32)
    s = gamma / jnp.sqrt(var + eps)
    return s, beta - mean * s


# ---------------------------------------------------------------------------
# GeneratorEnc parameters + forward
# ---------------------------------------------------------------------------
def init_params(key, in_channels, out_channels, compression, expansion,
                num_layers, h_dim):
    keys = iter(jax.random.split(key, 64))

    def nrm(k, shape, fan_in):
        return (jax.random.normal(k, shape, jnp.float32)
                / jnp.sqrt(jnp.float32(fan_in)))

    e, c = expansion, compression
    p = {}

    # Encoder: Conv2d(k4,s2,p1,bias=False) + BN + ReLU
    for name, cin, cout in (("enc1", in_channels, e),
                            ("enc2", e, 2 * e),
                            ("enc3", 2 * e, 4 * e)):
        w = nrm(next(keys), (cout, cin, 4, 4), cin * 16)
        s, b = _bn_fold(cout)
        p[name] = {"w": _conv_w_mat(w), "s": s, "b": b}

    # ResNet BasicBlocks (3x3 conv/BN x2, identity skip)
    p["res"] = []
    for _ in range(num_layers):
        w1 = nrm(next(keys), (4 * e, 4 * e, 3, 3), 4 * e * 9)
        w2 = nrm(next(keys), (4 * e, 4 * e, 3, 3), 4 * e * 9)
        s1, b1 = _bn_fold(4 * e)
        s2, b2 = _bn_fold(4 * e)
        p["res"].append({"w1": _conv_w_mat(w1), "s1": s1, "b1": b1,
                         "w2": _conv_w_mat(w2), "s2": s2, "b2": b2})

    # FC (flatten_dim -> h_dim) composed with the 1x1-spatial first deconv
    # ConvTranspose2d(h_dim, 4c, 3, s1, p0) into ONE matmul (no nonlinearity
    # between them); BN(4c) folded into per-column scale/bias.
    flat = 4 * e * 3 * 3
    wfc = nrm(next(keys), (h_dim, flat), flat)             # torch (out,in), in=(c,h,w)
    bfc = 0.01 * jax.random.normal(next(keys), (h_dim,), jnp.float32)
    wd1 = nrm(next(keys), (h_dim, 4 * c, 3, 3), h_dim * 9)
    # permute FC input ordering from NCHW-flatten (c,h,w) to NHWC-flatten (h,w,c)
    wfc_nhwc = wfc.reshape(h_dim, 4 * e, 3, 3).transpose(0, 2, 3, 1).reshape(h_dim, flat)
    wd1_cols = wd1.transpose(0, 2, 3, 1).reshape(h_dim, 9 * 4 * c)   # cols (kh,kw,co)
    sd1, bd1 = _bn_fold(4 * c)
    s_col = jnp.tile(sd1, 9)
    p["fc_dec1"] = {"w": wfc_nhwc.T @ wd1_cols,
                    "s": s_col,
                    "b": s_col * (bfc @ wd1_cols) + jnp.tile(bd1, 9)}

    # Decoder: ConvTranspose2d(k4,s2,p1) layers as shuffle-convs
    wd2 = nrm(next(keys), (4 * c, 2 * c, 4, 4), 4 * c * 16)
    wd3 = nrm(next(keys), (2 * c, c, 4, 4), 2 * c * 16)
    wd4 = nrm(next(keys), (c, out_channels, 4, 4), c * 16)
    bd4 = 0.01 * jax.random.normal(next(keys), (out_channels,), jnp.float32)
    s2d, b2d = _bn_fold(2 * c)
    s3d, b3d = _bn_fold(c)
    p["dec2"] = {"w": _deconv_s2_shuffle_w(wd2),
                 "s": jnp.tile(s2d, 4), "b": jnp.tile(b2d, 4)}
    p["dec3"] = {"w": _deconv_s2_shuffle_w(wd3),
                 "s": jnp.tile(s3d, 4), "b": jnp.tile(b3d, 4)}
    p["dec4"] = {"w": _deconv_s2_shuffle_w(wd4),
                 "s": jnp.tile(jnp.ones((out_channels,), jnp.float32), 4),
                 "b": jnp.tile(bd4, 4)}
    return p


def generator_enc_forward(params, x, *, expansion, compression, num_layers,
                          h_dim, out_channels):
    e, c = expansion, compression
    B = x.shape[0]
    out = jnp.transpose(x, (0, 2, 3, 1))                    # NCHW -> NHWC once

    # ------------------ Encoder ------------------
    l = params["enc1"]
    out = conv2d_nhwc(out, l["w"], e, 4, 4, 2, 1, l["s"], l["b"], "relu")
    l = params["enc2"]
    out = conv2d_nhwc(out, l["w"], 2 * e, 4, 4, 2, 1, l["s"], l["b"], "relu")
    l = params["enc3"]
    out = conv2d_nhwc(out, l["w"], 4 * e, 4, 4, 2, 1, l["s"], l["b"], "relu")

    # ResNet BasicBlock stack; residual add (+ optional ReLU) fused into the
    # epilogue of the second conv's matmul.
    for i, blk in enumerate(params["res"]):
        last_activation = (i != num_layers - 1)
        identity = out
        h = conv2d_nhwc(out, blk["w1"], 4 * e, 3, 3, 1, 1,
                        blk["s1"], blk["b1"], "relu")
        out = conv2d_nhwc(h, blk["w2"], 4 * e, 3, 3, 1, 1,
                          blk["s2"], blk["b2"],
                          "relu" if last_activation else "none",
                          residual=identity)

    flat = out.reshape(B, -1)                 # NHWC flatten; fc weight permuted at init

    # FC + first deconv (1x1 spatial) fused into a single matmul; output is
    # the 3x3 NHWC feature map of the decoder's first stage (post BN+ReLU).
    fd = params["fc_dec1"]
    out = matmul_fused(flat, fd["w"], fd["s"], fd["b"], "relu").reshape(B, 3, 3, 4 * c)

    # ------------------ Decoder (eval mode) ------------------
    d = params["dec2"]
    out = conv_transpose2d_s2(out, d["w"], 2 * c, d["s"], d["b"], "relu")    # 6x6
    d = params["dec3"]
    out = conv_transpose2d_s2(out, d["w"], c, d["s"], d["b"], "relu")        # 12x12
    d = params["dec4"]
    out = conv_transpose2d_s2(out, d["w"], out_channels, d["s"], d["b"], "tanh")  # 24x24

    return jnp.transpose(out, (0, 3, 1, 2))                 # NHWC -> NCHW


if __name__ == "__main__":
    # Input spatial must be 24x24 so three k4/s2/p1 convs give 3x3
    # (flatten_dim = expansion*4*3*3), matching the module's hard-coded fc.
    IN_CHANNELS = 3
    OUT_CHANNELS = 3
    COMPRESSION = 8
    EXPANSION = 8
    NUM_LAYERS = 1
    H_DIM = 32
    BATCH = 2

    key = jax.random.PRNGKey(0)
    kx, kp = jax.random.split(key)
    x = jax.random.normal(kx, (BATCH, IN_CHANNELS, 24, 24), jnp.float32)
    params = init_params(kp, IN_CHANNELS, OUT_CHANNELS, COMPRESSION,
                         EXPANSION, NUM_LAYERS, H_DIM)

    fwd = jax.jit(functools.partial(
        generator_enc_forward,
        expansion=EXPANSION, compression=COMPRESSION, num_layers=NUM_LAYERS,
        h_dim=H_DIM, out_channels=OUT_CHANNELS))

    y = fwd(params, x)
    jax.block_until_ready(y)
    assert y.shape == (BATCH, OUT_CHANNELS, 24, 24), y.shape
    assert bool(jnp.all(jnp.isfinite(y)))
    print("KERNEL_OK")
</pallas_src>

<mosaic_0001>
module attributes {stable_mosaic.version = 11 : i64} {
  func.func @_matmul_kernel(%arg0: i32, %arg1: i32, %arg2: i32, %arg3: memref<288x128xbf16, #tpu.memory_space<vmem>>, %arg4: memref<128x128xbf16, #tpu.memory_space<vmem>>, %arg5: memref<1x128xf32, #tpu.memory_space<vmem>>, %arg6: memref<1x128xf32, #tpu.memory_space<vmem>>, %arg7: memref<288x128xf32, #tpu.memory_space<vmem>>) attributes {dimension_semantics = [#tpu.dimension_semantics<parallel>, #tpu.dimension_semantics<parallel>, #tpu.dimension_semantics<arbitrary>], iteration_bounds = array<i64: 1, 1, 1>, scalar_prefetch = 0 : i64, scratch_operands = 0 : i64, tpu.core_type = #tpu.core_type<tc>, window_params = [{transform_indices = @transform_0, window_bounds = array<i64: 288, 128>}, {transform_indices = @transform_1, window_bounds = array<i64: 128, 128>}, {transform_indices = @transform_2, window_bounds = array<i64: 1, 128>}, {transform_indices = @transform_3, window_bounds = array<i64: 1, 128>}, {transform_indices = @transform_4, window_bounds = array<i64: 288, 128>}]} {
    %c0_i32 = arith.constant 0 : i32
    %0 = arith.cmpi eq, %arg2, %c0_i32 : i32
    %1 = arith.extui %0 : i1 to i32
    %c0_i32_0 = arith.constant 0 : i32
    %2 = arith.cmpi ne, %1, %c0_i32_0 : i32
    scf.if %2 {
      %cst_10 = arith.constant 0.000000e+00 : f32
      %12 = vector.broadcast %cst_10 : f32 to vector<288x128xf32>
      %c0_11 = arith.constant 0 : index
      %c0_12 = arith.constant 0 : index
      %13 = vector.load %arg7[%c0_11, %c0_12] : memref<288x128xf32, #tpu.memory_space<vmem>>, vector<288x128xf32>
      tpu.vector_store %arg7[%c0_11, %c0_12], %12 {strides = array<i32>} : memref<288x128xf32, #tpu.memory_space<vmem>>, vector<288x128xf32>,
    } else {
    }
    %c0 = arith.constant 0 : index
    %c0_1 = arith.constant 0 : index
    %3 = vector.load %arg7[%c0, %c0_1] : memref<288x128xf32, #tpu.memory_space<vmem>>, vector<288x128xf32>
    %c0_2 = arith.constant 0 : index
    %c0_3 = arith.constant 0 : index
    %4 = vector.load %arg3[%c0_2, %c0_3] : memref<288x128xbf16, #tpu.memory_space<vmem>>, vector<288x128xbf16>
    %c0_4 = arith.constant 0 : index
    %c0_5 = arith.constant 0 : index
    %5 = vector.load %arg4[%c0_4, %c0_5] : memref<128x128xbf16, #tpu.memory_space<vmem>>, vector<128x128xbf16>
    %cst = arith.constant dense<0.000000e+00> : vector<288x128xf32>
    %6 = tpu.matmul %4, %5, %cst {dimension_numbers = #tpu.dot_dimension_numbers<[1], [0], [0], [1], [0, 0, 1, 1], [], []>} : vector<288x128xbf16>, vector<128x128xbf16>, vector<288x128xf32> -> vector<288x128xf32>
    %7 = arith.addf %3, %6 : vector<288x128xf32>
    %c0_6 = arith.constant 0 : index
    %c0_7 = arith.constant 0 : index
    %8 = vector.load %arg7[%c0_6, %c0_7] : memref<288x128xf32, #tpu.memory_space<vmem>>, vector<288x128xf32>
    tpu.vector_store %arg7[%c0_6, %c0_7], %7 {strides = array<i32>} : memref<288x128xf32, #tpu.memory_space<vmem>>, vector<288x128xf32>,
    %c0_i32_8 = arith.constant 0 : i32
    %9 = arith.cmpi eq, %arg2, %c0_i32_8 : i32
    %10 = arith.extui %9 : i1 to i32
    %c0_i32_9 = arith.constant 0 : i32
    %11 = arith.cmpi ne, %10, %c0_i32_9 : i32
    scf.if %11 {
      %c0_10 = arith.constant 0 : index
      %c0_11 = arith.constant 0 : index
      %12 = vector.load %arg7[%c0_10, %c0_11] : memref<288x128xf32, #tpu.memory_space<vmem>>, vector<288x128xf32>
      %c0_12 = arith.constant 0 : index
      %c0_13 = arith.constant 0 : index
      %13 = vector.load %arg5[%c0_12, %c0_13] : memref<1x128xf32, #tpu.memory_space<vmem>>, vector<1x128xf32>
      %14 = vector.broadcast %13 : vector<1x128xf32> to vector<288x128xf32>
      %15 = arith.mulf %12, %14 : vector<288x128xf32>
      %c0_14 = arith.constant 0 : index
      %c0_15 = arith.constant 0 : index
      %16 = vector.load %arg6[%c0_14, %c0_15] : memref<1x128xf32, #tpu.memory_space<vmem>>, vector<1x128xf32>
      %17 = vector.broadcast %16 : vector<1x128xf32> to vector<288x128xf32>
      %18 = arith.addf %15, %17 : vector<288x128xf32>
      %cst_16 = arith.constant 0.000000e+00 : f32
      %19 = vector.broadcast %cst_16 : f32 to vector<288x128xf32>
      %20 = arith.maximumf %18, %19 : vector<288x128xf32>
      %c0_17 = arith.constant 0 : index
      %c0_18 = arith.constant 0 : index
      %21 = vector.load %arg7[%c0_17, %c0_18] : memref<288x128xf32, #tpu.memory_space<vmem>>, vector<288x128xf32>
      tpu.vector_store %arg7[%c0_17, %c0_18], %20 {strides = array<i32>} : memref<288x128xf32, #tpu.memory_space<vmem>>, vector<288x128xf32>,
    } else {
    }
    return
  }
  func.func @transform_0(%arg0: i32, %arg1: i32, %arg2: i32) -> (i32, i32) {
    %c0_i32 = arith.constant 0 : i32
    return %arg0, %arg2 : i32, i32
  }
  func.func @transform_1(%arg0: i32, %arg1: i32, %arg2: i32) -> (i32, i32) {
    %c0_i32 = arith.constant 0 : i32
    return %arg2, %arg1 : i32, i32
  }
  func.func @transform_2(%arg0: i32, %arg1: i32, %arg2: i32) -> (i32, i32) {
    %c0_i32 = arith.constant 0 : i32
    %c0_i32_0 = arith.constant 0 : i32
    return %c0_i32, %arg1 : i32, i32
  }
  func.func @transform_3(%arg0: i32, %arg1: i32, %arg2: i32) -> (i32, i32) {
    %c0_i32 = arith.constant 0 : i32
    %c0_i32_0 = arith.constant 0 : i32
    return %c0_i32, %arg1 : i32, i32
  }
  func.func @transform_4(%arg0: i32, %arg1: i32, %arg2: i32) -> (i32, i32) {
    %c0_i32 = arith.constant 0 : i32
    return %arg0, %arg1 : i32, i32
  }
}

module attributes {stable_mosaic.version = 11 : i64} {
  func.func @_matmul_kernel(%arg0: i32, %arg1: i32, %arg2: i32, %arg3: memref<80x128xbf16, #tpu.memory_space<vmem>>, %arg4: memref<128x128xbf16, #tpu.memory_space<vmem>>, %arg5: memref<1x128xf32, #tpu.memory_space<vmem>>, %arg6: memref<1x128xf32, #tpu.memory_space<vmem>>, %arg7: memref<80x128xf32, #tpu.memory_space<vmem>>) attributes {dimension_semantics = [#tpu.dimension_semantics<parallel>, #tpu.dimension_semantics<parallel>, #tpu.dimension_semantics<arbitrary>], iteration_bounds = array<i64: 1, 1, 1>, scalar_prefetch = 0 : i64, scratch_operands = 0 : i64, tpu.core_type = #tpu.core_type<tc>, window_params = [{transform_indices = @transform_0, window_bounds = array<i64: 80, 128>}, {transform_indices = @transform_1, window_bounds = array<i64: 128, 128>}, {transform_indices = @transform_2, window_bounds = array<i64: 1, 128>}, {transform_indices = @transform_3, window_bounds = array<i64: 1, 128>}, {transform_indices = @transform_4, window_bounds = array<i64: 80, 128>}]} {
    %c0_i32 = arith.constant 0 : i32
    %0 = arith.cmpi eq, %arg2, %c0_i32 : i32
    %1 = arith.extui %0 : i1 to i32
    %c0_i32_0 = arith.constant 0 : i32
    %2 = arith.cmpi ne, %1, %c0_i32_0 : i32
    scf.if %2 {
      %cst_10 = arith.constant 0.000000e+00 : f32
      %12 = vector.broadcast %cst_10 : f32 to vector<80x128xf32>
      %c0_11 = arith.constant 0 : index
      %c0_12 = arith.constant 0 : index
      %13 = vector.load %arg7[%c0_11, %c0_12] : memref<80x128xf32, #tpu.memory_space<vmem>>, vector<80x128xf32>
      tpu.vector_store %arg7[%c0_11, %c0_12], %12 {strides = array<i32>} : memref<80x128xf32, #tpu.memory_space<vmem>>, vector<80x128xf32>,
    } else {
    }
    %c0 = arith.constant 0 : index
    %c0_1 = arith.constant 0 : index
    %3 = vector.load %arg7[%c0, %c0_1] : memref<80x128xf32, #tpu.memory_space<vmem>>, vector<80x128xf32>
    %c0_2 = arith.constant 0 : index
    %c0_3 = arith.constant 0 : index
    %4 = vector.load %arg3[%c0_2, %c0_3] : memref<80x128xbf16, #tpu.memory_space<vmem>>, vector<80x128xbf16>
    %c0_4 = arith.constant 0 : index
    %c0_5 = arith.constant 0 : index
    %5 = vector.load %arg4[%c0_4, %c0_5] : memref<128x128xbf16, #tpu.memory_space<vmem>>, vector<128x128xbf16>
    %cst = arith.constant dense<0.000000e+00> : vector<80x128xf32>
    %6 = tpu.matmul %4, %5, %cst {dimension_numbers = #tpu.dot_dimension_numbers<[1], [0], [0], [1], [0, 0, 1, 1], [], []>} : vector<80x128xbf16>, vector<128x128xbf16>, vector<80x128xf32> -> vector<80x128xf32>
    %7 = arith.addf %3, %6 : vector<80x128xf32>
    %c0_6 = arith.constant 0 : index
    %c0_7 = arith.constant 0 : index
    %8 = vector.load %arg7[%c0_6, %c0_7] : memref<80x128xf32, #tpu.memory_space<vmem>>, vector<80x128xf32>
    tpu.vector_store %arg7[%c0_6, %c0_7], %7 {strides = array<i32>} : memref<80x128xf32, #tpu.memory_space<vmem>>, vector<80x128xf32>,
    %c0_i32_8 = arith.constant 0 : i32
    %9 = arith.cmpi eq, %arg2, %c0_i32_8 : i32
    %10 = arith.extui %9 : i1 to i32
    %c0_i32_9 = arith.constant 0 : i32
    %11 = arith.cmpi ne, %10, %c0_i32_9 : i32
    scf.if %11 {
      %c0_10 = arith.constant 0 : index
      %c0_11 = arith.constant 0 : index
      %12 = vector.load %arg7[%c0_10, %c0_11] : memref<80x128xf32, #tpu.memory_space<vmem>>, vector<80x128xf32>
      %c0_12 = arith.constant 0 : index
      %c0_13 = arith.constant 0 : index
      %13 = vector.load %arg5[%c0_12, %c0_13] : memref<1x128xf32, #tpu.memory_space<vmem>>, vector<1x128xf32>
      %14 = vector.broadcast %13 : vector<1x128xf32> to vector<80x128xf32>
      %15 = arith.mulf %12, %14 : vector<80x128xf32>
      %c0_14 = arith.constant 0 : index
      %c0_15 = arith.constant 0 : index
      %16 = vector.load %arg6[%c0_14, %c0_15] : memref<1x128xf32, #tpu.memory_space<vmem>>, vector<1x128xf32>
      %17 = vector.broadcast %16 : vector<1x128xf32> to vector<80x128xf32>
      %18 = arith.addf %15, %17 : vector<80x128xf32>
      %cst_16 = arith.constant 0.000000e+00 : f32
      %19 = vector.broadcast %cst_16 : f32 to vector<80x128xf32>
      %20 = arith.maximumf %18, %19 : vector<80x128xf32>
      %c0_17 = arith.constant 0 : index
      %c0_18 = arith.constant 0 : index
      %21 = vector.load %arg7[%c0_17, %c0_18] : memref<80x128xf32, #tpu.memory_space<vmem>>, vector<80x128xf32>
      tpu.vector_store %arg7[%c0_17, %c0_18], %20 {strides = array<i32>} : memref<80x128xf32, #tpu.memory_space<vmem>>, vector<80x128xf32>,
    } else {
    }
    return
  }
  func.func @transform_0(%arg0: i32, %arg1: i32, %arg2: i32) -> (i32, i32) {
    %c0_i32 = arith.constant 0 : i32
    return %arg0, %arg2 : i32, i32
  }
  func.func @transform_1(%arg0: i32, %arg1: i32, %arg2: i32) -> (i32, i32) {
    %c0_i32 = arith.constant 0 : i32
    return %arg2, %arg1 : i32, i32
  }
  func.func @transform_2(%arg0: i32, %arg1: i32, %arg2: i32) -> (i32, i32) {
    %c0_i32 = arith.constant 0 : i32
    %c0_i32_0 = arith.constant 0 : i32
    return %c0_i32, %arg1 : i32, i32
  }
  func.func @transform_3(%arg0: i32, %arg1: i32, %arg2: i32) -> (i32, i32) {
    %c0_i32 = arith.constant 0 : i32
    %c0_i32_0 = arith.constant 0 : i32
    return %c0_i32, %arg1 : i32, i32
  }
  func.func @transform_4(%arg0: i32, %arg1: i32, %arg2: i32) -> (i32, i32) {
    %c0_i32 = arith.constant 0 : i32
    return %arg0, %arg1 : i32, i32
  }
}

module attributes {stable_mosaic.version = 11 : i64} {
  func.func @_matmul_kernel(%arg0: i32, %arg1: i32, %arg2: i32, %arg3: memref<32x256xbf16, #tpu.memory_space<vmem>>, %arg4: memref<256x128xbf16, #tpu.memory_space<vmem>>, %arg5: memref<1x128xf32, #tpu.memory_space<vmem>>, %arg6: memref<1x128xf32, #tpu.memory_space<vmem>>, %arg7: memref<32x128xf32, #tpu.memory_space<vmem>>) attributes {dimension_semantics = [#tpu.dimension_semantics<parallel>, #tpu.dimension_semantics<parallel>, #tpu.dimension_semantics<arbitrary>], iteration_bounds = array<i64: 1, 1, 1>, scalar_prefetch = 0 : i64, scratch_operands = 0 : i64, tpu.core_type = #tpu.core_type<tc>, window_params = [{transform_indices = @transform_0, window_bounds = array<i64: 32, 256>}, {transform_indices = @transform_1, window_bounds = array<i64: 256, 128>}, {transform_indices = @transform_2, window_bounds = array<i64: 1, 128>}, {transform_indices = @transform_3, window_bounds = array<i64: 1, 128>}, {transform_indices = @transform_4, window_bounds = array<i64: 32, 128>}]} {
    %c0_i32 = arith.constant 0 : i32
    %0 = arith.cmpi eq, %arg2, %c0_i32 : i32
    %1 = arith.extui %0 : i1 to i32
    %c0_i32_0 = arith.constant 0 : i32
    %2 = arith.cmpi ne, %1, %c0_i32_0 : i32
    scf.if %2 {
      %cst_10 = arith.constant 0.000000e+00 : f32
      %12 = vector.broadcast %cst_10 : f32 to vector<32x128xf32>
      %c0_11 = arith.constant 0 : index
      %c0_12 = arith.constant 0 : index
      %13 = vector.load %arg7[%c0_11, %c0_12] : memref<32x128xf32, #tpu.memory_space<vmem>>, vector<32x128xf32>
      tpu.vector_store %arg7[%c0_11, %c0_12], %12 {strides = array<i32>} : memref<32x128xf32, #tpu.memory_space<vmem>>, vector<32x128xf32>,
    } else {
    }
    %c0 = arith.constant 0 : index
    %c0_1 = arith.constant 0 : index
    %3 = vector.load %arg7[%c0, %c0_1] : memref<32x128xf32, #tpu.memory_space<vmem>>, vector<32x128xf32>
    %c0_2 = arith.constant 0 : index
    %c0_3 = arith.constant 0 : index
    %4 = vector.load %arg3[%c0_2, %c0_3] : memref<32x256xbf16, #tpu.memory_space<vmem>>, vector<32x256xbf16>
    %c0_4 = arith.constant 0 : index
    %c0_5 = arith.constant 0 : index
    %5 = vector.load %arg4[%c0_4, %c0_5] : memref<256x128xbf16, #tpu.memory_space<vmem>>, vector<256x128xbf16>
    %cst = arith.constant dense<0.000000e+00> : vector<32x128xf32>
    %6 = tpu.matmul %4, %5, %cst {dimension_numbers = #tpu.dot_dimension_numbers<[1], [0], [0], [1], [0, 0, 1, 1], [], []>} : vector<32x256xbf16>, vector<256x128xbf16>, vector<32x128xf32> -> vector<32x128xf32>
    %7 = arith.addf %3, %6 : vector<32x128xf32>
    %c0_6 = arith.constant 0 : index
    %c0_7 = arith.constant 0 : index
    %8 = vector.load %arg7[%c0_6, %c0_7] : memref<32x128xf32, #tpu.memory_space<vmem>>, vector<32x128xf32>
    tpu.vector_store %arg7[%c0_6, %c0_7], %7 {strides = array<i32>} : memref<32x128xf32, #tpu.memory_space<vmem>>, vector<32x128xf32>,
    %c0_i32_8 = arith.constant 0 : i32
    %9 = arith.cmpi eq, %arg2, %c0_i32_8 : i32
    %10 = arith.extui %9 : i1 to i32
    %c0_i32_9 = arith.constant 0 : i32
    %11 = arith.cmpi ne, %10, %c0_i32_9 : i32
    scf.if %11 {
      %c0_10 = arith.constant 0 : index
      %c0_11 = arith.constant 0 : index
      %12 = vector.load %arg7[%c0_10, %c0_11] : memref<32x128xf32, #tpu.memory_space<vmem>>, vector<32x128xf32>
      %c0_12 = arith.constant 0 : index
      %c0_13 = arith.constant 0 : index
      %13 = vector.load %arg5[%c0_12, %c0_13] : memref<1x128xf32, #tpu.memory_space<vmem>>, vector<1x128xf32>
      %14 = vector.broadcast %13 : vector<1x128xf32> to vector<32x128xf32>
      %15 = arith.mulf %12, %14 : vector<32x128xf32>
      %c0_14 = arith.constant 0 : index
      %c0_15 = arith.constant 0 : index
      %16 = vector.load %arg6[%c0_14, %c0_15] : memref<1x128xf32, #tpu.memory_space<vmem>>, vector<1x128xf32>
      %17 = vector.broadcast %16 : vector<1x128xf32> to vector<32x128xf32>
      %18 = arith.addf %15, %17 : vector<32x128xf32>
      %cst_16 = arith.constant 0.000000e+00 : f32
      %19 = vector.broadcast %cst_16 : f32 to vector<32x128xf32>
      %20 = arith.maximumf %18, %19 : vector<32x128xf32>
      %c0_17 = arith.constant 0 : index
      %c0_18 = arith.constant 0 : index
      %21 = vector.load %arg7[%c0_17, %c0_18] : memref<32x128xf32, #tpu.memory_space<vmem>>, vector<32x128xf32>
      tpu.vector_store %arg7[%c0_17, %c0_18], %20 {strides = array<i32>} : memref<32x128xf32, #tpu.memory_space<vmem>>, vector<32x128xf32>,
    } else {
    }
    return
  }
  func.func @transform_0(%arg0: i32, %arg1: i32, %arg2: i32) -> (i32, i32) {
    %c0_i32 = arith.constant 0 : i32
    return %arg0, %arg2 : i32, i32
  }
  func.func @transform_1(%arg0: i32, %arg1: i32, %arg2: i32) -> (i32, i32) {
    %c0_i32 = arith.constant 0 : i32
    return %arg2, %arg1 : i32, i32
  }
  func.func @transform_2(%arg0: i32, %arg1: i32, %arg2: i32) -> (i32, i32) {
    %c0_i32 = arith.constant 0 : i32
    %c0_i32_0 = arith.constant 0 : i32
    return %c0_i32, %arg1 : i32, i32
  }
  func.func @transform_3(%arg0: i32, %arg1: i32, %arg2: i32) -> (i32, i32) {
    %c0_i32 = arith.constant 0 : i32
    %c0_i32_0 = arith.constant 0 : i32
    return %c0_i32, %arg1 : i32, i32
  }
  func.func @transform_4(%arg0: i32, %arg1: i32, %arg2: i32) -> (i32, i32) {
    %c0_i32 = arith.constant 0 : i32
    return %arg0, %arg1 : i32, i32
  }
}

module attributes {stable_mosaic.version = 11 : i64} {
  func.func @_matmul_kernel(%arg0: i32, %arg1: i32, %arg2: i32, %arg3: memref<32x384xbf16, #tpu.memory_space<vmem>>, %arg4: memref<384x128xbf16, #tpu.memory_space<vmem>>, %arg5: memref<1x128xf32, #tpu.memory_space<vmem>>, %arg6: memref<1x128xf32, #tpu.memory_space<vmem>>, %arg7: memref<32x128xf32, #tpu.memory_space<vmem>>) attributes {dimension_semantics = [#tpu.dimension_semantics<parallel>, #tpu.dimension_semantics<parallel>, #tpu.dimension_semantics<arbitrary>], iteration_bounds = array<i64: 1, 1, 1>, scalar_prefetch = 0 : i64, scratch_operands = 0 : i64, tpu.core_type = #tpu.core_type<tc>, window_params = [{transform_indices = @transform_0, window_bounds = array<i64: 32, 384>}, {transform_indices = @transform_1, window_bounds = array<i64: 384, 128>}, {transform_indices = @transform_2, window_bounds = array<i64: 1, 128>}, {transform_indices = @transform_3, window_bounds = array<i64: 1, 128>}, {transform_indices = @transform_4, window_bounds = array<i64: 32, 128>}]} {
    %c0_i32 = arith.constant 0 : i32
    %0 = arith.cmpi eq, %arg2, %c0_i32 : i32
    %1 = arith.extui %0 : i1 to i32
    %c0_i32_0 = arith.constant 0 : i32
    %2 = arith.cmpi ne, %1, %c0_i32_0 : i32
    scf.if %2 {
      %cst_10 = arith.constant 0.000000e+00 : f32
      %12 = vector.broadcast %cst_10 : f32 to vector<32x128xf32>
      %c0_11 = arith.constant 0 : index
      %c0_12 = arith.constant 0 : index
      %13 = vector.load %arg7[%c0_11, %c0_12] : memref<32x128xf32, #tpu.memory_space<vmem>>, vector<32x128xf32>
      tpu.vector_store %arg7[%c0_11, %c0_12], %12 {strides = array<i32>} : memref<32x128xf32, #tpu.memory_space<vmem>>, vector<32x128xf32>,
    } else {
    }
    %c0 = arith.constant 0 : index
    %c0_1 = arith.constant 0 : index
    %3 = vector.load %arg7[%c0, %c0_1] : memref<32x128xf32, #tpu.memory_space<vmem>>, vector<32x128xf32>
    %c0_2 = arith.constant 0 : index
    %c0_3 = arith.constant 0 : index
    %4 = vector.load %arg3[%c0_2, %c0_3] : memref<32x384xbf16, #tpu.memory_space<vmem>>, vector<32x384xbf16>
    %c0_4 = arith.constant 0 : index
    %c0_5 = arith.constant 0 : index
    %5 = vector.load %arg4[%c0_4, %c0_5] : memref<384x128xbf16, #tpu.memory_space<vmem>>, vector<384x128xbf16>
    %cst = arith.constant dense<0.000000e+00> : vector<32x128xf32>
    %6 = tpu.matmul %4, %5, %cst {dimension_numbers = #tpu.dot_dimension_numbers<[1], [0], [0], [1], [0, 0, 1, 1], [], []>} : vector<32x384xbf16>, vector<384x128xbf16>, vector<32x128xf32> -> vector<32x128xf32>
    %7 = arith.addf %3, %6 : vector<32x128xf32>
    %c0_6 = arith.constant 0 : index
    %c0_7 = arith.constant 0 : index
    %8 = vector.load %arg7[%c0_6, %c0_7] : memref<32x128xf32, #tpu.memory_space<vmem>>, vector<32x128xf32>
    tpu.vector_store %arg7[%c0_6, %c0_7], %7 {strides = array<i32>} : memref<32x128xf32, #tpu.memory_space<vmem>>, vector<32x128xf32>,
    %c0_i32_8 = arith.constant 0 : i32
    %9 = arith.cmpi eq, %arg2, %c0_i32_8 : i32
    %10 = arith.extui %9 : i1 to i32
    %c0_i32_9 = arith.constant 0 : i32
    %11 = arith.cmpi ne, %10, %c0_i32_9 : i32
    scf.if %11 {
      %c0_10 = arith.constant 0 : index
      %c0_11 = arith.constant 0 : index
      %12 = vector.load %arg7[%c0_10, %c0_11] : memref<32x128xf32, #tpu.memory_space<vmem>>, vector<32x128xf32>
      %c0_12 = arith.constant 0 : index
      %c0_13 = arith.constant 0 : index
      %13 = vector.load %arg5[%c0_12, %c0_13] : memref<1x128xf32, #tpu.memory_space<vmem>>, vector<1x128xf32>
      %14 = vector.broadcast %13 : vector<1x128xf32> to vector<32x128xf32>
      %15 = arith.mulf %12, %14 : vector<32x128xf32>
      %c0_14 = arith.constant 0 : index
      %c0_15 = arith.constant 0 : index
      %16 = vector.load %arg6[%c0_14, %c0_15] : memref<1x128xf32, #tpu.memory_space<vmem>>, vector<1x128xf32>
      %17 = vector.broadcast %16 : vector<1x128xf32> to vector<32x128xf32>
      %18 = arith.addf %15, %17 : vector<32x128xf32>
      %cst_16 = arith.constant 0.000000e+00 : f32
      %19 = vector.broadcast %cst_16 : f32 to vector<32x128xf32>
      %20 = arith.maximumf %18, %19 : vector<32x128xf32>
      %c0_17 = arith.constant 0 : index
      %c0_18 = arith.constant 0 : index
      %21 = vector.load %arg7[%c0_17, %c0_18] : memref<32x128xf32, #tpu.memory_space<vmem>>, vector<32x128xf32>
      tpu.vector_store %arg7[%c0_17, %c0_18], %20 {strides = array<i32>} : memref<32x128xf32, #tpu.memory_space<vmem>>, vector<32x128xf32>,
    } else {
    }
    return
  }
  func.func @transform_0(%arg0: i32, %arg1: i32, %arg2: i32) -> (i32, i32) {
    %c0_i32 = arith.constant 0 : i32
    return %arg0, %arg2 : i32, i32
  }
  func.func @transform_1(%arg0: i32, %arg1: i32, %arg2: i32) -> (i32, i32) {
    %c0_i32 = arith.constant 0 : i32
    return %arg2, %arg1 : i32, i32
  }
  func.func @transform_2(%arg0: i32, %arg1: i32, %arg2: i32) -> (i32, i32) {
    %c0_i32 = arith.constant 0 : i32
    %c0_i32_0 = arith.constant 0 : i32
    return %c0_i32, %arg1 : i32, i32
  }
  func.func @transform_3(%arg0: i32, %arg1: i32, %arg2: i32) -> (i32, i32) {
    %c0_i32 = arith.constant 0 : i32
    %c0_i32_0 = arith.constant 0 : i32
    return %c0_i32, %arg1 : i32, i32
  }
  func.func @transform_4(%arg0: i32, %arg1: i32, %arg2: i32) -> (i32, i32) {
    %c0_i32 = arith.constant 0 : i32
    return %arg0, %arg1 : i32, i32
  }
}

module attributes {stable_mosaic.version = 11 : i64} {
  func.func @_matmul_kernel(%arg0: i32, %arg1: i32, %arg2: i32, %arg3: memref<32x384xbf16, #tpu.memory_space<vmem>>, %arg4: memref<384x128xbf16, #tpu.memory_space<vmem>>, %arg5: memref<1x128xf32, #tpu.memory_space<vmem>>, %arg6: memref<1x128xf32, #tpu.memory_space<vmem>>, %arg7: memref<32x128xf32, #tpu.memory_space<vmem>>, %arg8: memref<32x128xf32, #tpu.memory_space<vmem>>) attributes {dimension_semantics = [#tpu.dimension_semantics<parallel>, #tpu.dimension_semantics<parallel>, #tpu.dimension_semantics<arbitrary>], iteration_bounds = array<i64: 1, 1, 1>, scalar_prefetch = 0 : i64, scratch_operands = 0 : i64, tpu.core_type = #tpu.core_type<tc>, window_params = [{transform_indices = @transform_0, window_bounds = array<i64: 32, 384>}, {transform_indices = @transform_1, window_bounds = array<i64: 384, 128>}, {transform_indices = @transform_2, window_bounds = array<i64: 1, 128>}, {transform_indices = @transform_3, window_bounds = array<i64: 1, 128>}, {transform_indices = @transform_4, window_bounds = array<i64: 32, 128>}, {transform_indices = @transform_5, window_bounds = array<i64: 32, 128>}]} {
    %c0_i32 = arith.constant 0 : i32
    %0 = arith.cmpi eq, %arg2, %c0_i32 : i32
    %1 = arith.extui %0 : i1 to i32
    %c0_i32_0 = arith.constant 0 : i32
    %2 = arith.cmpi ne, %1, %c0_i32_0 : i32
    scf.if %2 {
      %cst_10 = arith.constant 0.000000e+00 : f32
      %12 = vector.broadcast %cst_10 : f32 to vector<32x128xf32>
      %c0_11 = arith.constant 0 : index
      %c0_12 = arith.constant 0 : index
      %13 = vector.load %arg8[%c0_11, %c0_12] : memref<32x128xf32, #tpu.memory_space<vmem>>, vector<32x128xf32>
      tpu.vector_store %arg8[%c0_11, %c0_12], %12 {strides = array<i32>} : memref<32x128xf32, #tpu.memory_space<vmem>>, vector<32x128xf32>,
    } else {
    }
    %c0 = arith.constant 0 : index
    %c0_1 = arith.constant 0 : index
    %3 = vector.load %arg8[%c0, %c0_1] : memref<32x128xf32, #tpu.memory_space<vmem>>, vector<32x128xf32>
    %c0_2 = arith.constant 0 : index
    %c0_3 = arith.constant 0 : index
    %4 = vector.load %arg3[%c0_2, %c0_3] : memref<32x384xbf16, #tpu.memory_space<vmem>>, vector<32x384xbf16>
    %c0_4 = arith.constant 0 : index
    %c0_5 = arith.constant 0 : index
    %5 = vector.load %arg4[%c0_4, %c0_5] : memref<384x128xbf16, #tpu.memory_space<vmem>>, vector<384x128xbf16>
    %cst = arith.constant dense<0.000000e+00> : vector<32x128xf32>
    %6 = tpu.matmul %4, %5, %cst {dimension_numbers = #tpu.dot_dimension_numbers<[1], [0], [0], [1], [0, 0, 1, 1], [], []>} : vector<32x384xbf16>, vector<384x128xbf16>, vector<32x128xf32> -> vector<32x128xf32>
    %7 = arith.addf %3, %6 : vector<32x128xf32>
    %c0_6 = arith.constant 0 : index
    %c0_7 = arith.constant 0 : index
    %8 = vector.load %arg8[%c0_6, %c0_7] : memref<32x128xf32, #tpu.memory_space<vmem>>, vector<32x128xf32>
    tpu.vector_store %arg8[%c0_6, %c0_7], %7 {strides = array<i32>} : memref<32x128xf32, #tpu.memory_space<vmem>>, vector<32x128xf32>,
    %c0_i32_8 = arith.constant 0 : i32
    %9 = arith.cmpi eq, %arg2, %c0_i32_8 : i32
    %10 = arith.extui %9 : i1 to i32
    %c0_i32_9 = arith.constant 0 : i32
    %11 = arith.cmpi ne, %10, %c0_i32_9 : i32
    scf.if %11 {
      %c0_10 = arith.constant 0 : index
      %c0_11 = arith.constant 0 : index
      %12 = vector.load %arg8[%c0_10, %c0_11] : memref<32x128xf32, #tpu.memory_space<vmem>>, vector<32x128xf32>
      %c0_12 = arith.constant 0 : index
      %c0_13 = arith.constant 0 : index
      %13 = vector.load %arg5[%c0_12, %c0_13] : memref<1x128xf32, #tpu.memory_space<vmem>>, vector<1x128xf32>
      %14 = vector.broadcast %13 : vector<1x128xf32> to vector<32x128xf32>
      %15 = arith.mulf %12, %14 : vector<32x128xf32>
      %c0_14 = arith.constant 0 : index
      %c0_15 = arith.constant 0 : index
      %16 = vector.load %arg6[%c0_14, %c0_15] : memref<1x128xf32, #tpu.memory_space<vmem>>, vector<1x128xf32>
      %17 = vector.broadcast %16 : vector<1x128xf32> to vector<32x128xf32>
      %18 = arith.addf %15, %17 : vector<32x128xf32>
      %c0_16 = arith.constant 0 : index
      %c0_17 = arith.constant 0 : index
      %19 = vector.load %arg7[%c0_16, %c0_17] : memref<32x128xf32, #tpu.memory_space<vmem>>, vector<32x128xf32>
      %20 = arith.addf %18, %19 : vector<32x128xf32>
      %c0_18 = arith.constant 0 : index
      %c0_19 = arith.constant 0 : index
      %21 = vector.load %arg8[%c0_18, %c0_19] : memref<32x128xf32, #tpu.memory_space<vmem>>, vector<32x128xf32>
      tpu.vector_store %arg8[%c0_18, %c0_19], %20 {strides = array<i32>} : memref<32x128xf32, #tpu.memory_space<vmem>>, vector<32x128xf32>,
    } else {
    }
    return
  }
  func.func @transform_0(%arg0: i32, %arg1: i32, %arg2: i32) -> (i32, i32) {
    %c0_i32 = arith.constant 0 : i32
    return %arg0, %arg2 : i32, i32
  }
  func.func @transform_1(%arg0: i32, %arg1: i32, %arg2: i32) -> (i32, i32) {
    %c0_i32 = arith.constant 0 : i32
    return %arg2, %arg1 : i32, i32
  }
  func.func @transform_2(%arg0: i32, %arg1: i32, %arg2: i32) -> (i32, i32) {
    %c0_i32 = arith.constant 0 : i32
    %c0_i32_0 = arith.constant 0 : i32
    return %c0_i32, %arg1 : i32, i32
  }
  func.func @transform_3(%arg0: i32, %arg1: i32, %arg2: i32) -> (i32, i32) {
    %c0_i32 = arith.constant 0 : i32
    %c0_i32_0 = arith.constant 0 : i32
    return %c0_i32, %arg1 : i32, i32
  }
  func.func @transform_4(%arg0: i32, %arg1: i32, %arg2: i32) -> (i32, i32) {
    %c0_i32 = arith.constant 0 : i32
    return %arg0, %arg1 : i32, i32
  }
  func.func @transform_5(%arg0: i32, %arg1: i32, %arg2: i32) -> (i32, i32) {
    %c0_i32 = arith.constant 0 : i32
    return %arg0, %arg1 : i32, i32
  }
}

module attributes {stable_mosaic.version = 11 : i64} {
  func.func @_matmul_kernel(%arg0: i32, %arg1: i32, %arg2: i32, %arg3: memref<16x384xbf16, #tpu.memory_space<vmem>>, %arg4: memref<384x384xbf16, #tpu.memory_space<vmem>>, %arg5: memref<1x384xf32, #tpu.memory_space<vmem>>, %arg6: memref<1x384xf32, #tpu.memory_space<vmem>>, %arg7: memref<16x384xf32, #tpu.memory_space<vmem>>) attributes {dimension_semantics = [#tpu.dimension_semantics<parallel>, #tpu.dimension_semantics<parallel>, #tpu.dimension_semantics<arbitrary>], iteration_bounds = array<i64: 1, 1, 1>, scalar_prefetch = 0 : i64, scratch_operands = 0 : i64, tpu.core_type = #tpu.core_type<tc>, window_params = [{transform_indices = @transform_0, window_bounds = array<i64: 16, 384>}, {transform_indices = @transform_1, window_bounds = array<i64: 384, 384>}, {transform_indices = @transform_2, window_bounds = array<i64: 1, 384>}, {transform_indices = @transform_3, window_bounds = array<i64: 1, 384>}, {transform_indices = @transform_4, window_bounds = array<i64: 16, 384>}]} {
    %c0_i32 = arith.constant 0 : i32
    %0 = arith.cmpi eq, %arg2, %c0_i32 : i32
    %1 = arith.extui %0 : i1 to i32
    %c0_i32_0 = arith.constant 0 : i32
    %2 = arith.cmpi ne, %1, %c0_i32_0 : i32
    scf.if %2 {
      %cst_10 = arith.constant 0.000000e+00 : f32
      %12 = vector.broadcast %cst_10 : f32 to vector<16x384xf32>
      %c0_11 = arith.constant 0 : index
      %c0_12 = arith.constant 0 : index
      %13 = vector.load %arg7[%c0_11, %c0_12] : memref<16x384xf32, #tpu.memory_space<vmem>>, vector<16x384xf32>
      tpu.vector_store %arg7[%c0_11, %c0_12], %12 {strides = array<i32>} : memref<16x384xf32, #tpu.memory_space<vmem>>, vector<16x384xf32>,
    } else {
    }
    %c0 = arith.constant 0 : index
    %c0_1 = arith.constant 0 : index
    %3 = vector.load %arg7[%c0, %c0_1] : memref<16x384xf32, #tpu.memory_space<vmem>>, vector<16x384xf32>
    %c0_2 = arith.constant 0 : index
    %c0_3 = arith.constant 0 : index
    %4 = vector.load %arg3[%c0_2, %c0_3] : memref<16x384xbf16, #tpu.memory_space<vmem>>, vector<16x384xbf16>
    %c0_4 = arith.constant 0 : index
    %c0_5 = arith.constant 0 : index
    %5 = vector.load %arg4[%c0_4, %c0_5] : memref<384x384xbf16, #tpu.memory_space<vmem>>, vector<384x384xbf16>
    %cst = arith.constant dense<0.000000e+00> : vector<16x384xf32>
    %6 = tpu.matmul %4, %5, %cst {dimension_numbers = #tpu.dot_dimension_numbers<[1], [0], [0], [1], [0, 0, 1, 1], [], []>} : vector<16x384xbf16>, vector<384x384xbf16>, vector<16x384xf32> -> vector<16x384xf32>
    %7 = arith.addf %3, %6 : vector<16x384xf32>
    %c0_6 = arith.constant 0 : index
    %c0_7 = arith.constant 0 : index
    %8 = vector.load %arg7[%c0_6, %c0_7] : memref<16x384xf32, #tpu.memory_space<vmem>>, vector<16x384xf32>
    tpu.vector_store %arg7[%c0_6, %c0_7], %7 {strides = array<i32>} : memref<16x384xf32, #tpu.memory_space<vmem>>, vector<16x384xf32>,
    %c0_i32_8 = arith.constant 0 : i32
    %9 = arith.cmpi eq, %arg2, %c0_i32_8 : i32
    %10 = arith.extui %9 : i1 to i32
    %c0_i32_9 = arith.constant 0 : i32
    %11 = arith.cmpi ne, %10, %c0_i32_9 : i32
    scf.if %11 {
      %c0_10 = arith.constant 0 : index
      %c0_11 = arith.constant 0 : index
      %12 = vector.load %arg7[%c0_10, %c0_11] : memref<16x384xf32, #tpu.memory_space<vmem>>, vector<16x384xf32>
      %c0_12 = arith.constant 0 : index
      %c0_13 = arith.constant 0 : index
      %13 = vector.load %arg5[%c0_12, %c0_13] : memref<1x384xf32, #tpu.memory_space<vmem>>, vector<1x384xf32>
      %14 = vector.broadcast %13 : vector<1x384xf32> to vector<16x384xf32>
      %15 = arith.mulf %12, %14 : vector<16x384xf32>
      %c0_14 = arith.constant 0 : index
      %c0_15 = arith.constant 0 : index
      %16 = vector.load %arg6[%c0_14, %c0_15] : memref<1x384xf32, #tpu.memory_space<vmem>>, vector<1x384xf32>
      %17 = vector.broadcast %16 : vector<1x384xf32> to vector<16x384xf32>
      %18 = arith.addf %15, %17 : vector<16x384xf32>
      %cst_16 = arith.constant 0.000000e+00 : f32
      %19 = vector.broadcast %cst_16 : f32 to vector<16x384xf32>
      %20 = arith.maximumf %18, %19 : vector<16x384xf32>
      %c0_17 = arith.constant 0 : index
      %c0_18 = arith.constant 0 : index
      %21 = vector.load %arg7[%c0_17, %c0_18] : memref<16x384xf32, #tpu.memory_space<vmem>>, vector<16x384xf32>
      tpu.vector_store %arg7[%c0_17, %c0_18], %20 {strides = array<i32>} : memref<16x384xf32, #tpu.memory_space<vmem>>, vector<16x384xf32>,
    } else {
    }
    return
  }
  func.func @transform_0(%arg0: i32, %arg1: i32, %arg2: i32) -> (i32, i32) {
    %c0_i32 = arith.constant 0 : i32
    return %arg0, %arg2 : i32, i32
  }
  func.func @transform_1(%arg0: i32, %arg1: i32, %arg2: i32) -> (i32, i32) {
    %c0_i32 = arith.constant 0 : i32
    return %arg2, %arg1 : i32, i32
  }
  func.func @transform_2(%arg0: i32, %arg1: i32, %arg2: i32) -> (i32, i32) {
    %c0_i32 = arith.constant 0 : i32
    %c0_i32_0 = arith.constant 0 : i32
    return %c0_i32, %arg1 : i32, i32
  }
  func.func @transform_3(%arg0: i32, %arg1: i32, %arg2: i32) -> (i32, i32) {
    %c0_i32 = arith.constant 0 : i32
    %c0_i32_0 = arith.constant 0 : i32
    return %c0_i32, %arg1 : i32, i32
  }
  func.func @transform_4(%arg0: i32, %arg1: i32, %arg2: i32) -> (i32, i32) {
    %c0_i32 = arith.constant 0 : i32
    return %arg0, %arg1 : i32, i32
  }
}

module attributes {stable_mosaic.version = 11 : i64} {
  func.func @_matmul_kernel(%arg0: i32, %arg1: i32, %arg2: i32, %arg3: memref<80x256xbf16, #tpu.memory_space<vmem>>, %arg4: memref<256x128xbf16, #tpu.memory_space<vmem>>, %arg5: memref<1x128xf32, #tpu.memory_space<vmem>>, %arg6: memref<1x128xf32, #tpu.memory_space<vmem>>, %arg7: memref<80x128xf32, #tpu.memory_space<vmem>>) attributes {dimension_semantics = [#tpu.dimension_semantics<parallel>, #tpu.dimension_semantics<parallel>, #tpu.dimension_semantics<arbitrary>], iteration_bounds = array<i64: 1, 1, 1>, scalar_prefetch = 0 : i64, scratch_operands = 0 : i64, tpu.core_type = #tpu.core_type<tc>, window_params = [{transform_indices = @transform_0, window_bounds = array<i64: 80, 256>}, {transform_indices = @transform_1, window_bounds = array<i64: 256, 128>}, {transform_indices = @transform_2, window_bounds = array<i64: 1, 128>}, {transform_indices = @transform_3, window_bounds = array<i64: 1, 128>}, {transform_indices = @transform_4, window_bounds = array<i64: 80, 128>}]} {
    %c0_i32 = arith.constant 0 : i32
    %0 = arith.cmpi eq, %arg2, %c0_i32 : i32
    %1 = arith.extui %0 : i1 to i32
    %c0_i32_0 = arith.constant 0 : i32
    %2 = arith.cmpi ne, %1, %c0_i32_0 : i32
    scf.if %2 {
      %cst_10 = arith.constant 0.000000e+00 : f32
      %12 = vector.broadcast %cst_10 : f32 to vector<80x128xf32>
      %c0_11 = arith.constant 0 : index
      %c0_12 = arith.constant 0 : index
      %13 = vector.load %arg7[%c0_11, %c0_12] : memref<80x128xf32, #tpu.memory_space<vmem>>, vector<80x128xf32>
      tpu.vector_store %arg7[%c0_11, %c0_12], %12 {strides = array<i32>} : memref<80x128xf32, #tpu.memory_space<vmem>>, vector<80x128xf32>,
    } else {
    }
    %c0 = arith.constant 0 : index
    %c0_1 = arith.constant 0 : index
    %3 = vector.load %arg7[%c0, %c0_1] : memref<80x128xf32, #tpu.memory_space<vmem>>, vector<80x128xf32>
    %c0_2 = arith.constant 0 : index
    %c0_3 = arith.constant 0 : index
    %4 = vector.load %arg3[%c0_2, %c0_3] : memref<80x256xbf16, #tpu.memory_space<vmem>>, vector<80x256xbf16>
    %c0_4 = arith.constant 0 : index
    %c0_5 = arith.constant 0 : index
    %5 = vector.load %arg4[%c0_4, %c0_5] : memref<256x128xbf16, #tpu.memory_space<vmem>>, vector<256x128xbf16>
    %cst = arith.constant dense<0.000000e+00> : vector<80x128xf32>
    %6 = tpu.matmul %4, %5, %cst {dimension_numbers = #tpu.dot_dimension_numbers<[1], [0], [0], [1], [0, 0, 1, 1], [], []>} : vector<80x256xbf16>, vector<256x128xbf16>, vector<80x128xf32> -> vector<80x128xf32>
    %7 = arith.addf %3, %6 : vector<80x128xf32>
    %c0_6 = arith.constant 0 : index
    %c0_7 = arith.constant 0 : index
    %8 = vector.load %arg7[%c0_6, %c0_7] : memref<80x128xf32, #tpu.memory_space<vmem>>, vector<80x128xf32>
    tpu.vector_store %arg7[%c0_6, %c0_7], %7 {strides = array<i32>} : memref<80x128xf32, #tpu.memory_space<vmem>>, vector<80x128xf32>,
    %c0_i32_8 = arith.constant 0 : i32
    %9 = arith.cmpi eq, %arg2, %c0_i32_8 : i32
    %10 = arith.extui %9 : i1 to i32
    %c0_i32_9 = arith.constant 0 : i32
    %11 = arith.cmpi ne, %10, %c0_i32_9 : i32
    scf.if %11 {
      %c0_10 = arith.constant 0 : index
      %c0_11 = arith.constant 0 : index
      %12 = vector.load %arg7[%c0_10, %c0_11] : memref<80x128xf32, #tpu.memory_space<vmem>>, vector<80x128xf32>
      %c0_12 = arith.constant 0 : index
      %c0_13 = arith.constant 0 : index
      %13 = vector.load %arg5[%c0_12, %c0_13] : memref<1x128xf32, #tpu.memory_space<vmem>>, vector<1x128xf32>
      %14 = vector.broadcast %13 : vector<1x128xf32> to vector<80x128xf32>
      %15 = arith.mulf %12, %14 : vector<80x128xf32>
      %c0_14 = arith.constant 0 : index
      %c0_15 = arith.constant 0 : index
      %16 = vector.load %arg6[%c0_14, %c0_15] : memref<1x128xf32, #tpu.memory_space<vmem>>, vector<1x128xf32>
      %17 = vector.broadcast %16 : vector<1x128xf32> to vector<80x128xf32>
      %18 = arith.addf %15, %17 : vector<80x128xf32>
      %cst_16 = arith.constant 0.000000e+00 : f32
      %19 = vector.broadcast %cst_16 : f32 to vector<80x128xf32>
      %20 = arith.maximumf %18, %19 : vector<80x128xf32>
      %c0_17 = arith.constant 0 : index
      %c0_18 = arith.constant 0 : index
      %21 = vector.load %arg7[%c0_17, %c0_18] : memref<80x128xf32, #tpu.memory_space<vmem>>, vector<80x128xf32>
      tpu.vector_store %arg7[%c0_17, %c0_18], %20 {strides = array<i32>} : memref<80x128xf32, #tpu.memory_space<vmem>>, vector<80x128xf32>,
    } else {
    }
    return
  }
  func.func @transform_0(%arg0: i32, %arg1: i32, %arg2: i32) -> (i32, i32) {
    %c0_i32 = arith.constant 0 : i32
    return %arg0, %arg2 : i32, i32
  }
  func.func @transform_1(%arg0: i32, %arg1: i32, %arg2: i32) -> (i32, i32) {
    %c0_i32 = arith.constant 0 : i32
    return %arg2, %arg1 : i32, i32
  }
  func.func @transform_2(%arg0: i32, %arg1: i32, %arg2: i32) -> (i32, i32) {
    %c0_i32 = arith.constant 0 : i32
    %c0_i32_0 = arith.constant 0 : i32
    return %c0_i32, %arg1 : i32, i32
  }
  func.func @transform_3(%arg0: i32, %arg1: i32, %arg2: i32) -> (i32, i32) {
    %c0_i32 = arith.constant 0 : i32
    %c0_i32_0 = arith.constant 0 : i32
    return %c0_i32, %arg1 : i32, i32
  }
  func.func @transform_4(%arg0: i32, %arg1: i32, %arg2: i32) -> (i32, i32) {
    %c0_i32 = arith.constant 0 : i32
    return %arg0, %arg1 : i32, i32
  }
}

module attributes {stable_mosaic.version = 11 : i64} {
  func.func @_matmul_kernel(%arg0: i32, %arg1: i32, %arg2: i32, %arg3: memref<288x128xbf16, #tpu.memory_space<vmem>>, %arg4: memref<128x128xbf16, #tpu.memory_space<vmem>>, %arg5: memref<1x128xf32, #tpu.memory_space<vmem>>, %arg6: memref<1x128xf32, #tpu.memory_space<vmem>>, %arg7: memref<288x128xf32, #tpu.memory_space<vmem>>) attributes {dimension_semantics = [#tpu.dimension_semantics<parallel>, #tpu.dimension_semantics<parallel>, #tpu.dimension_semantics<arbitrary>], iteration_bounds = array<i64: 1, 1, 1>, scalar_prefetch = 0 : i64, scratch_operands = 0 : i64, tpu.core_type = #tpu.core_type<tc>, window_params = [{transform_indices = @transform_0, window_bounds = array<i64: 288, 128>}, {transform_indices = @transform_1, window_bounds = array<i64: 128, 128>}, {transform_indices = @transform_2, window_bounds = array<i64: 1, 128>}, {transform_indices = @transform_3, window_bounds = array<i64: 1, 128>}, {transform_indices = @transform_4, window_bounds = array<i64: 288, 128>}]} {
    %c0_i32 = arith.constant 0 : i32
    %0 = arith.cmpi eq, %arg2, %c0_i32 : i32
    %1 = arith.extui %0 : i1 to i32
    %c0_i32_0 = arith.constant 0 : i32
    %2 = arith.cmpi ne, %1, %c0_i32_0 : i32
    scf.if %2 {
      %cst_10 = arith.constant 0.000000e+00 : f32
      %12 = vector.broadcast %cst_10 : f32 to vector<288x128xf32>
      %c0_11 = arith.constant 0 : index
      %c0_12 = arith.constant 0 : index
      %13 = vector.load %arg7[%c0_11, %c0_12] : memref<288x128xf32, #tpu.memory_space<vmem>>, vector<288x128xf32>
      tpu.vector_store %arg7[%c0_11, %c0_12], %12 {strides = array<i32>} : memref<288x128xf32, #tpu.memory_space<vmem>>, vector<288x128xf32>,
    } else {
    }
    %c0 = arith.constant 0 : index
    %c0_1 = arith.constant 0 : index
    %3 = vector.load %arg7[%c0, %c0_1] : memref<288x128xf32, #tpu.memory_space<vmem>>, vector<288x128xf32>
    %c0_2 = arith.constant 0 : index
    %c0_3 = arith.constant 0 : index
    %4 = vector.load %arg3[%c0_2, %c0_3] : memref<288x128xbf16, #tpu.memory_space<vmem>>, vector<288x128xbf16>
    %c0_4 = arith.constant 0 : index
    %c0_5 = arith.constant 0 : index
    %5 = vector.load %arg4[%c0_4, %c0_5] : memref<128x128xbf16, #tpu.memory_space<vmem>>, vector<128x128xbf16>
    %cst = arith.constant dense<0.000000e+00> : vector<288x128xf32>
    %6 = tpu.matmul %4, %5, %cst {dimension_numbers = #tpu.dot_dimension_numbers<[1], [0], [0], [1], [0, 0, 1, 1], [], []>} : vector<288x128xbf16>, vector<128x128xbf16>, vector<288x128xf32> -> vector<288x128xf32>
    %7 = arith.addf %3, %6 : vector<288x128xf32>
    %c0_6 = arith.constant 0 : index
    %c0_7 = arith.constant 0 : index
    %8 = vector.load %arg7[%c0_6, %c0_7] : memref<288x128xf32, #tpu.memory_space<vmem>>, vector<288x128xf32>
    tpu.vector_store %arg7[%c0_6, %c0_7], %7 {strides = array<i32>} : memref<288x128xf32, #tpu.memory_space<vmem>>, vector<288x128xf32>,
    %c0_i32_8 = arith.constant 0 : i32
    %9 = arith.cmpi eq, %arg2, %c0_i32_8 : i32
    %10 = arith.extui %9 : i1 to i32
    %c0_i32_9 = arith.constant 0 : i32
    %11 = arith.cmpi ne, %10, %c0_i32_9 : i32
    scf.if %11 {
      %c0_10 = arith.constant 0 : index
      %c0_11 = arith.constant 0 : index
      %12 = vector.load %arg7[%c0_10, %c0_11] : memref<288x128xf32, #tpu.memory_space<vmem>>, vector<288x128xf32>
      %c0_12 = arith.constant 0 : index
      %c0_13 = arith.constant 0 : index
      %13 = vector.load %arg5[%c0_12, %c0_13] : memref<1x128xf32, #tpu.memory_space<vmem>>, vector<1x128xf32>
      %14 = vector.broadcast %13 : vector<1x128xf32> to vector<288x128xf32>
      %15 = arith.mulf %12, %14 : vector<288x128xf32>
      %c0_14 = arith.constant 0 : index
      %c0_15 = arith.constant 0 : index
      %16 = vector.load %arg6[%c0_14, %c0_15] : memref<1x128xf32, #tpu.memory_space<vmem>>, vector<1x128xf32>
      %17 = vector.broadcast %16 : vector<1x128xf32> to vector<288x128xf32>
      %18 = arith.addf %15, %17 : vector<288x128xf32>
      %19 = math.tanh %18 : vector<288x128xf32>
      %c0_16 = arith.constant 0 : index
      %c0_17 = arith.constant 0 : index
      %20 = vector.load %arg7[%c0_16, %c0_17] : memref<288x128xf32, #tpu.memory_space<vmem>>, vector<288x128xf32>
      tpu.vector_store %arg7[%c0_16, %c0_17], %19 {strides = array<i32>} : memref<288x128xf32, #tpu.memory_space<vmem>>, vector<288x128xf32>,
    } else {
    }
    return
  }
  func.func @transform_0(%arg0: i32, %arg1: i32, %arg2: i32) -> (i32, i32) {
    %c0_i32 = arith.constant 0 : i32
    return %arg0, %arg2 : i32, i32
  }
  func.func @transform_1(%arg0: i32, %arg1: i32, %arg2: i32) -> (i32, i32) {
    %c0_i32 = arith.constant 0 : i32
    return %arg2, %arg1 : i32, i32
  }
  func.func @transform_2(%arg0: i32, %arg1: i32, %arg2: i32) -> (i32, i32) {
    %c0_i32 = arith.constant 0 : i32
    %c0_i32_0 = arith.constant 0 : i32
    return %c0_i32, %arg1 : i32, i32
  }
  func.func @transform_3(%arg0: i32, %arg1: i32, %arg2: i32) -> (i32, i32) {
    %c0_i32 = arith.constant 0 : i32
    %c0_i32_0 = arith.constant 0 : i32
    return %c0_i32, %arg1 : i32, i32
  }
  func.func @transform_4(%arg0: i32, %arg1: i32, %arg2: i32) -> (i32, i32) {
    %c0_i32 = arith.constant 0 : i32
    return %arg0, %arg1 : i32, i32
  }
}

</mosaic_0001>

<bundles_post_ra>
// kernel: generator_enc_forward.9
= control target key start
LH: loop header
LB: loop body
LE: loop exit
PB: predicated region body
PF: predicated region fallthrough
CT: control target
= control target key end

     0   :  { %s1194_s1 = inlined_call_operand.vmem [shape: bf16[128,128], index: 1, kind: input, shape index: {}]   ;;  %s1195_s0 = inlined_call_operand.vmem [shape: bf16[288,128], index: 0, kind: input, shape index: {}]   ;;  %s1196_s2 = inlined_call_operand.vmem [shape: f32[1,128], index: 2, kind: input, shape index: {}]   ;;  %s1197_s3 = inlined_call_operand.vmem [shape: f32[1,128], index: 3, kind: input, shape index: {}]   ;;  %s1198_s4 = inlined_call_operand.vmem [shape: f32[288,128], index: 4, kind: output, shape index: {}]  }
   0x1   :  { %v875_v0 = vld [vmem:[%s1194_s1 + $0x38] sm:$0xff]   ;;  %v876_v1 = vld [vmem:[%s1194_s1 + $0x30] sm:$0xff]   ;;  %v877_v2 = vld [vmem:[%s1194_s1 + $0x28] sm:$0xff]  }
   0x2   :  { %806 = vmatprep.subr.bf16.mxu0 %v875_v0  ;;  %858 = vmatprep.subr.bf16.mxu1 %v875_v0  ;;  %v878_v3 = vld [vmem:[%s1194_s1 + $0x20] sm:$0xff]   ;;  %v885_v5 = vld [vmem:[%s1195_s0 + $0x50] sm:$0xff]   ;;  %v879_v6 = vld [vmem:[%s1194_s1 + $0x18] sm:$0xff]  }
   0x3   :  { %807 = vmatpush3.bf16.msra.mxu0 %v875_v0  ;;  %866 = vmatpush3.bf16.msra.mxu1 %v875_v0  ;;  %v883_v4 = vld [vmem:[%s1195_s0] sm:$0xff]   ;;  %v880_v7 = vld [vmem:[%s1194_s1 + $0x10] sm:$0xff]   ;;  %v881_v8 = vld [vmem:[%s1194_s1 + $0x8] sm:$0xff]  }
   0x4   :  { %808 = vmatprep.subr.bf16.mxu0 %v876_v1  ;;  %859 = vmatprep.subr.bf16.mxu1 %v876_v1  ;;  %v882_v9 = vld [vmem:[%s1194_s1] sm:$0xff]   ;;  %v884_v10 = vld [vmem:[%s1195_s0 + $0x8] sm:$0xff]   ;;  %v886_v11 = vld [vmem:[%s1195_s0 + $0x58] sm:$0xff]  }
   0x5   :  { %822 = vmatprep.mubr.bf16.mxu0 %v883_v4  ;;  %842 = vmatprep.mubr.bf16.mxu1 %v885_v5  ;;  %v887_v12 = vld [vmem:[%s1195_s0 + $0x10] sm:$0xff]   ;;  %v889_v13 = vld [vmem:[%s1195_s0 + $0x60] sm:$0xff]   ;;  %v888_v14 = vld [vmem:[%s1195_s0 + $0x18] sm:$0xff]  }
   0x6   :  { %v890_v15 = vld [vmem:[%s1195_s0 + $0x68] sm:$0xff]   ;;  %v891_v16 = vld [vmem:[%s1195_s0 + $0x20] sm:$0xff]   ;;  %v893_v17 = vld [vmem:[%s1195_s0 + $0x70] sm:$0xff]  }
   0x7   :  { %809 = vmatpush3.bf16.msra.mxu0 %v876_v1  ;;  %867 = vmatpush3.bf16.msra.mxu1 %v876_v1  ;;  %v892_v18 = vld [vmem:[%s1195_s0 + $0x28] sm:$0xff]   ;;  %v894_v19 = vld [vmem:[%s1195_s0 + $0x78] sm:$0xff]   ;;  %v895_v20 = vld [vmem:[%s1195_s0 + $0x30] sm:$0xff]  }
   0x8   :  { %810 = vmatprep.subr.bf16.mxu0 %v877_v2  ;;  %860 = vmatprep.subr.bf16.mxu1 %v877_v2  ;;  %v897_v21 = vld [vmem:[%s1195_s0 + $0x80] sm:$0xff]   ;;  %v896_v22 = vld [vmem:[%s1195_s0 + $0x38] sm:$0xff]   ;;  %v898_v23 = vld [vmem:[%s1195_s0 + $0x88] sm:$0xff]  }
   0x9   :  { %v899_v24 = vld [vmem:[%s1195_s0 + $0x40] sm:$0xff]   ;;  %v900_v25 = vld [vmem:[%s1195_s0 + $0x48] sm:$0xff]  }
   0xa   :  { %v1007_v27 = vld [vmem:[%s1196_s2] ss:$0 sm:$0xff] }
   0xb   :  { %811 = vmatpush3.bf16.msra.mxu0 %v877_v2  ;;  %868 = vmatpush3.bf16.msra.mxu1 %v877_v2  ;;  %v1012_v29 = vld [vmem:[%s1197_s3] ss:$0 sm:$0xff] }
   0xc   :  { %812 = vmatprep.subr.bf16.mxu0 %v878_v3  ;;  %861 = vmatprep.subr.bf16.mxu1 %v878_v3 }
   0xf   :  { %813 = vmatpush3.bf16.msra.mxu0 %v878_v3  ;;  %869 = vmatpush3.bf16.msra.mxu1 %v878_v3 }
  0x10   :  { %814 = vmatprep.subr.bf16.mxu0 %v879_v6  ;;  %862 = vmatprep.subr.bf16.mxu1 %v879_v6 }
  0x13   :  { %815 = vmatpush3.bf16.msra.mxu0 %v879_v6  ;;  %870 = vmatpush3.bf16.msra.mxu1 %v879_v6 }
  0x14   :  { %816 = vmatprep.subr.bf16.mxu0 %v880_v7  ;;  %863 = vmatprep.subr.bf16.mxu1 %v880_v7 }
  0x17   :  { %817 = vmatpush3.bf16.msra.mxu0 %v880_v7  ;;  %871 = vmatpush3.bf16.msra.mxu1 %v880_v7 }
  0x18   :  { %818 = vmatprep.subr.bf16.mxu0 %v881_v8  ;;  %864 = vmatprep.subr.bf16.mxu1 %v881_v8 }
  0x1b   :  { %819 = vmatpush3.bf16.msra.mxu0 %v881_v8  ;;  %872 = vmatpush3.bf16.msra.mxu1 %v881_v8 }
  0x1c   :  { %820 = vmatprep.subr.bf16.mxu0 %v882_v9  ;;  %865 = vmatprep.subr.bf16.mxu1 %v882_v9 }
  0x1f   :  { %821 = vmatpush3.bf16.msra.mxu0 %v882_v9  ;;  %873 = vmatpush3.bf16.msra.mxu1 %v882_v9 }
  0x22   :  { %823 = vmatmul.mubr.bf16.vlgmr.msra.gmra.mxu0 %v884_v10  ;;  %843 = vmatmul.mubr.bf16.vlgmr.msra.gmra.mxu1 %v886_v11 }
  0x23   :  { %826 = vmatprep.mubr.bf16.mxu0 %v887_v12  ;;  %846 = vmatprep.mubr.bf16.mxu1 %v889_v13 }
  0x2a   :  { %827 = vmatmul.mubr.bf16.gmra.mxu0 %v888_v14  ;;  %847 = vmatmul.mubr.bf16.gmra.mxu1 %v890_v15 }
  0x2b   :  { %830 = vmatprep.mubr.bf16.mxu0 %v891_v16  ;;  %850 = vmatprep.mubr.bf16.mxu1 %v893_v17 }
  0x32   :  { %831 = vmatmul.mubr.bf16.gmra.mxu0 %v892_v18  ;;  %851 = vmatmul.mubr.bf16.gmra.mxu1 %v894_v19 }
  0x33   :  { %834 = vmatprep.mubr.bf16.mxu0 %v895_v20  ;;  %854 = vmatprep.mubr.bf16.mxu1 %v897_v21 }
  0x3a   :  { %835 = vmatmul.mubr.bf16.gmra.mxu0 %v896_v22  ;;  %855 = vmatmul.mubr.bf16.gmra.mxu1 %v898_v23 }
  0x3b   :  { %838 = vmatprep.mubr.bf16.mxu0 %v899_v24 }
  0x42   :  { %839 = vmatmul.mubr.bf16.gmra.mxu0 %v900_v25 }
  0xe2   :  { %v824_v26 = vpop.f32.mrf.mxu0  ;;  %v844_v28 = vpop.f32.mrf.mxu1 }
  0xe3   :  { %v599_v32 = vmul.f32 %v824_v26, %v1007_v27  ;;  %v619_v33 = vmul.f32 %v844_v28, %v1007_v27 }
  0xe4   :  { %v336_v30 = vpop.f32.mrf.mxu0  ;;  %v416_v31 = vpop.f32.mrf.mxu1 }
  0xe5   :  { %v642_v36 = vadd.f32 %v1012_v29, %v599_v32  ;;  %v597_v37 = vmul.f32 %v1007_v27, %v336_v30  ;;  %v662_v38 = vadd.f32 %v1012_v29, %v619_v33  ;;  %v617_v39 = vmul.f32 %v1007_v27, %v416_v31 }
  0xe6   :  { %v825_v34 = vpop.f32.mrf.mxu0  ;;  %v845_v35 = vpop.f32.mrf.mxu1 }
  0xe7   :  { %v678_v42 = vmax.f32 %v642_v36, 0.0  ;;  %v640_v43 = vadd.f32 %v1012_v29, %v597_v37  ;;  %v698_v44 = vmax.f32 %v662_v38, 0.0  ;;  %v600_v45 = vmul.f32 %v825_v34, %v1007_v27 }
  0xe8   :  { %v339_v40 = vpop.f32.mrf.mxu0  ;;  %v419_v41 = vpop.f32.mrf.mxu1  ;;  %v660_v46 = vadd.f32 %v1012_v29, %v617_v39  ;;  %v620_v47 = vmul.f32 %v845_v35, %v1007_v27 }
  0xe9   :  { %714 = vst [vmem:[%s1198_s4 + $0x10] sm:$0xff] %v678_v42  ;;  %v676_v50 = vmax.f32 %v640_v43, 0.0  ;;  %734 = vst [vmem:[%s1198_s4 + $0xb0] sm:$0xff] %v698_v44  ;;  %v643_v51 = vadd.f32 %v1012_v29, %v600_v45  ;;  %v598_v53 = vmul.f32 %v1007_v27, %v339_v40  ;;  %v618_v55 = vmul.f32 %v1007_v27, %v419_v41 }
  0xea   :  { %v828_v48 = vpop.f32.mrf.mxu0  ;;  %v848_v49 = vpop.f32.mrf.mxu1  ;;  %v696_v52 = vmax.f32 %v660_v46, 0.0  ;;  %v663_v54 = vadd.f32 %v1012_v29, %v620_v47 }
  0xeb   :  { %712 = vst [vmem:[%s1198_s4] sm:$0xff] %v676_v50  ;;  %v679_v58 = vmax.f32 %v643_v51, 0.0  ;;  %v603_v59 = vmul.f32 %v828_v48, %v1007_v27  ;;  %v623_v60 = vmul.f32 %v848_v49, %v1007_v27  ;;  %v641_v61 = vadd.f32 %v1012_v29, %v598_v53 }
  0xec   :  { %v352_v56 = vpop.f32.mrf.mxu0  ;;  %v432_v57 = vpop.f32.mrf.mxu1  ;;  %732 = vst [vmem:[%s1198_s4 + $0xa0] sm:$0xff] %v696_v52  ;;  %v699_v62 = vmax.f32 %v663_v54, 0.0  ;;  %v661_v63 = vadd.f32 %v1012_v29, %v618_v55 }
  0xed   :  { %715 = vst [vmem:[%s1198_s4 + $0x18] sm:$0xff] %v679_v58  ;;  %v646_v2 = vadd.f32 %v1012_v29, %v603_v59  ;;  %v601_v3 = vmul.f32 %v1007_v27, %v352_v56  ;;  %v666_v4 = vadd.f32 %v1012_v29, %v623_v60  ;;  %v677_v5 = vmax.f32 %v641_v61, 0.0 }
  0xee   :  { %v829_v0 = vpop.f32.mrf.mxu0  ;;  %v849_v1 = vpop.f32.mrf.mxu1  ;;  %735 = vst [vmem:[%s1198_s4 + $0xb8] sm:$0xff] %v699_v62  ;;  %v697_v6 = vmax.f32 %v661_v63, 0.0  ;;  %v621_v7 = vmul.f32 %v1007_v27, %v432_v57 }
  0xef   :  { %v682_v10 = vmax.f32 %v646_v2, 0.0  ;;  %v644_v11 = vadd.f32 %v1012_v29, %v601_v3  ;;  %v702_v12 = vmax.f32 %v666_v4, 0.0  ;;  %v604_v13 = vmul.f32 %v829_v0, %v1007_v27  ;;  %713 = vst [vmem:[%s1198_s4 + $0x8] sm:$0xff] %v677_v5 }
  0xf0   :  { %v355_v8 = vpop.f32.mrf.mxu0  ;;  %v435_v9 = vpop.f32.mrf.mxu1  ;;  %733 = vst [vmem:[%s1198_s4 + $0xa8] sm:$0xff] %v697_v6  ;;  %v664_v14 = vadd.f32 %v1012_v29, %v621_v7  ;;  %v624_v15 = vmul.f32 %v849_v1, %v1007_v27 }
  0xf1   :  { %718 = vst [vmem:[%s1198_s4 + $0x30] sm:$0xff] %v682_v10  ;;  %v680_v18 = vmax.f32 %v644_v11, 0.0  ;;  %738 = vst [vmem:[%s1198_s4 + $0xd0] sm:$0xff] %v702_v12  ;;  %v647_v19 = vadd.f32 %v1012_v29, %v604_v13  ;;  %v602_v21 = vmul.f32 %v1007_v27, %v355_v8  ;;  %v622_v23 = vmul.f32 %v1007_v27, %v435_v9 }
  0xf2   :  { %v832_v16 = vpop.f32.mrf.mxu0  ;;  %v852_v17 = vpop.f32.mrf.mxu1  ;;  %v700_v20 = vmax.f32 %v664_v14, 0.0  ;;  %v667_v22 = vadd.f32 %v1012_v29, %v624_v15 }
  0xf3   :  { %716 = vst [vmem:[%s1198_s4 + $0x20] sm:$0xff] %v680_v18  ;;  %v683_v26 = vmax.f32 %v647_v19, 0.0  ;;  %v607_v28 = vmul.f32 %v832_v16, %v1007_v27  ;;  %v627_v30 = vmul.f32 %v852_v17, %v1007_v27  ;;  %v645_v31 = vadd.f32 %v1012_v29, %v602_v21 }
  0xf4   :  { %v368_v24 = vpop.f32.mrf.mxu0  ;;  %v448_v25 = vpop.f32.mrf.mxu1  ;;  %736 = vst [vmem:[%s1198_s4 + $0xc0] sm:$0xff] %v700_v20  ;;  %v703_v32 = vmax.f32 %v667_v22, 0.0  ;;  %v665_v33 = vadd.f32 %v1012_v29, %v622_v23 }
  0xf5   :  { %719 = vst [vmem:[%s1198_s4 + $0x38] sm:$0xff] %v683_v26  ;;  %v650_v36 = vadd.f32 %v1012_v29, %v607_v28  ;;  %v605_v37 = vmul.f32 %v1007_v27, %v368_v24  ;;  %v670_v38 = vadd.f32 %v1012_v29, %v627_v30  ;;  %v681_v39 = vmax.f32 %v645_v31, 0.0 }
  0xf6   :  { %v833_v34 = vpop.f32.mrf.mxu0  ;;  %v853_v35 = vpop.f32.mrf.mxu1  ;;  %739 = vst [vmem:[%s1198_s4 + $0xd8] sm:$0xff] %v703_v32  ;;  %v701_v40 = vmax.f32 %v665_v33, 0.0  ;;  %v625_v41 = vmul.f32 %v1007_v27, %v448_v25 }
  0xf7   :  { %v686_v44 = vmax.f32 %v650_v36, 0.0  ;;  %v648_v45 = vadd.f32 %v1012_v29, %v605_v37  ;;  %v706_v46 = vmax.f32 %v670_v38, 0.0  ;;  %v608_v47 = vmul.f32 %v833_v34, %v1007_v27  ;;  %717 = vst [vmem:[%s1198_s4 + $0x28] sm:$0xff] %v681_v39 }
  0xf8   :  { %v371_v42 = vpop.f32.mrf.mxu0  ;;  %v451_v43 = vpop.f32.mrf.mxu1  ;;  %737 = vst [vmem:[%s1198_s4 + $0xc8] sm:$0xff] %v701_v40  ;;  %v668_v48 = vadd.f32 %v1012_v29, %v625_v41  ;;  %v628_v49 = vmul.f32 %v853_v35, %v1007_v27 }
  0xf9   :  { %722 = vst [vmem:[%s1198_s4 + $0x50] sm:$0xff] %v686_v44  ;;  %v684_v52 = vmax.f32 %v648_v45, 0.0  ;;  %742 = vst [vmem:[%s1198_s4 + $0xf0] sm:$0xff] %v706_v46  ;;  %v651_v53 = vadd.f32 %v1012_v29, %v608_v47  ;;  %v606_v55 = vmul.f32 %v1007_v27, %v371_v42  ;;  %v626_v57 = vmul.f32 %v1007_v27, %v451_v43 }
  0xfa   :  { %v836_v50 = vpop.f32.mrf.mxu0  ;;  %v856_v51 = vpop.f32.mrf.mxu1  ;;  %v704_v54 = vmax.f32 %v668_v48, 0.0  ;;  %v671_v56 = vadd.f32 %v1012_v29, %v628_v49 }
  0xfb   :  { %720 = vst [vmem:[%s1198_s4 + $0x40] sm:$0xff] %v684_v52  ;;  %v687_v60 = vmax.f32 %v651_v53, 0.0  ;;  %v611_v61 = vmul.f32 %v836_v50, %v1007_v27  ;;  %v631_v62 = vmul.f32 %v856_v51, %v1007_v27  ;;  %v649_v63 = vadd.f32 %v1012_v29, %v606_v55 }
  0xfc   :  { %v384_v58 = vpop.f32.mrf.mxu0  ;;  %v464_v59 = vpop.f32.mrf.mxu1  ;;  %740 = vst [vmem:[%s1198_s4 + $0xe0] sm:$0xff] %v704_v54  ;;  %v707_v0 = vmax.f32 %v671_v56, 0.0  ;;  %v669_v1 = vadd.f32 %v1012_v29, %v626_v57 }
  0xfd   :  { %723 = vst [vmem:[%s1198_s4 + $0x58] sm:$0xff] %v687_v60  ;;  %v654_v4 = vadd.f32 %v1012_v29, %v611_v61  ;;  %v609_v5 = vmul.f32 %v1007_v27, %v384_v58  ;;  %v674_v6 = vadd.f32 %v1012_v29, %v631_v62  ;;  %v685_v7 = vmax.f32 %v649_v63, 0.0 }
  0xfe   :  { %v837_v2 = vpop.f32.mrf.mxu0  ;;  %v857_v3 = vpop.f32.mrf.mxu1  ;;  %743 = vst [vmem:[%s1198_s4 + $0xf8] sm:$0xff] %v707_v0  ;;  %v705_v8 = vmax.f32 %v669_v1, 0.0  ;;  %v629_v9 = vmul.f32 %v1007_v27, %v464_v59 }
  0xff   :  { %v690_v12 = vmax.f32 %v654_v4, 0.0  ;;  %v652_v13 = vadd.f32 %v1012_v29, %v609_v5  ;;  %v710_v14 = vmax.f32 %v674_v6, 0.0  ;;  %v612_v15 = vmul.f32 %v837_v2, %v1007_v27  ;;  %721 = vst [vmem:[%s1198_s4 + $0x48] sm:$0xff] %v685_v7 }
 0x100   :  { %v387_v10 = vpop.f32.mrf.mxu0  ;;  %v467_v11 = vpop.f32.mrf.mxu1  ;;  %741 = vst [vmem:[%s1198_s4 + $0xe8] sm:$0xff] %v705_v8  ;;  %v672_v16 = vadd.f32 %v1012_v29, %v629_v9  ;;  %v632_v17 = vmul.f32 %v857_v3, %v1007_v27 }
 0x101   :  { %726 = vst [vmem:[%s1198_s4 + $0x70] sm:$0xff] %v690_v12  ;;  %v688_v19 = vmax.f32 %v652_v13, 0.0  ;;  %746 = vst [vmem:[%s1198_s4 + $0x110] sm:$0xff] %v710_v14  ;;  %v655_v20 = vadd.f32 %v1012_v29, %v612_v15  ;;  %v610_v22 = vmul.f32 %v1007_v27, %v387_v10  ;;  %v630_v24 = vmul.f32 %v1007_v27, %v467_v11 }
 0x102   :  { %v840_v18 = vpop.f32.mrf.mxu0  ;;  %v708_v21 = vmax.f32 %v672_v16, 0.0  ;;  %v675_v23 = vadd.f32 %v1012_v29, %v632_v17 }
 0x103   :  { %724 = vst [vmem:[%s1198_s4 + $0x60] sm:$0xff] %v688_v19  ;;  %v691_v26 = vmax.f32 %v655_v20, 0.0  ;;  %v615_v28 = vmul.f32 %v840_v18, %v1007_v27  ;;  %v653_v30 = vadd.f32 %v1012_v29, %v610_v22  ;;  %v673_v32 = vadd.f32 %v1012_v29, %v630_v24 }
 0x104   :  { %v400_v25 = vpop.f32.mrf.mxu0  ;;  %744 = vst [vmem:[%s1198_s4 + $0x100] sm:$0xff] %v708_v21  ;;  %v711_v31 = vmax.f32 %v675_v23, 0.0 }
 0x105   :  { %727 = vst [vmem:[%s1198_s4 + $0x78] sm:$0xff] %v691_v26  ;;  %v658_v34 = vadd.f32 %v1012_v29, %v615_v28  ;;  %v613_v35 = vmul.f32 %v1007_v27, %v400_v25  ;;  %v689_v36 = vmax.f32 %v653_v30, 0.0  ;;  %v709_v37 = vmax.f32 %v673_v32, 0.0 }
 0x106   :  { %v841_v33 = vpop.f32.mrf.mxu0  ;;  %747 = vst [vmem:[%s1198_s4 + $0x118] sm:$0xff] %v711_v31 }
 0x107   :  { %v694_v39 = vmax.f32 %v658_v34, 0.0  ;;  %v656_v40 = vadd.f32 %v1012_v29, %v613_v35  ;;  %v616_v41 = vmul.f32 %v841_v33, %v1007_v27  ;;  %725 = vst [vmem:[%s1198_s4 + $0x68] sm:$0xff] %v689_v36  ;;  %745 = vst [vmem:[%s1198_s4 + $0x108] sm:$0xff] %v709_v37 }
 0x108   :  { %v403_v38 = vpop.f32.mrf.mxu0 }
 0x109   :  { %730 = vst [vmem:[%s1198_s4 + $0x90] sm:$0xff] %v694_v39  ;;  %v692_v42 = vmax.f32 %v656_v40, 0.0  ;;  %v659_v43 = vadd.f32 %v1012_v29, %v616_v41  ;;  %v614_v44 = vmul.f32 %v1007_v27, %v403_v38 }
 0x10b   :  { %728 = vst [vmem:[%s1198_s4 + $0x80] sm:$0xff] %v692_v42  ;;  %v695_v45 = vmax.f32 %v659_v43, 0.0  ;;  %v657_v46 = vadd.f32 %v1012_v29, %v614_v44 }
 0x10d   :  { %731 = vst [vmem:[%s1198_s4 + $0x98] sm:$0xff] %v695_v45  ;;  %v693_v47 = vmax.f32 %v657_v46, 0.0 }
 0x10f   :  { %729 = vst [vmem:[%s1198_s4 + $0x88] sm:$0xff] %v693_v47 }

// kernel: generator_enc_forward.10
= control target key start
LH: loop header
LB: loop body
LE: loop exit
PB: predicated region body
PF: predicated region fallthrough
CT: control target
= control target key end

     0   :  { %v405_v0 = vmov 0.0   ;;  %vm406_vm0 = vmmov 0   ;;  %s512_s1 = inlined_call_operand.vmem [shape: bf16[128,128], index: 1, kind: input, shape index: {}]   ;;  %s513_s0 = inlined_call_operand.vmem [shape: bf16[80,128], index: 0, kind: input, shape index: {}]   ;;  %s514_s2 = inlined_call_operand.vmem [shape: f32[1,128], index: 2, kind: input, shape index: {}]   ;;  %s515_s3 = inlined_call_operand.vmem [shape: f32[1,128], index: 3, kind: input, shape index: {}]   ;;  %s516_s4 = inlined_call_operand.vmem [shape: f32[80,128], index: 4, kind: output, shape index: {}]  }
   0x1   :  { %338 = vmatprep.subr.bf16.mxu0 %v405_v0  ;;  %v392_v1 = vld [vmem:[%s512_s1 + $0x38] sm:$0xff]   ;;  %374 = vmatprep.subr.bf16.mxu1 %v405_v0  ;;  %v393_v2 = vld [vmem:[%s512_s1 + $0x30] sm:$0xff]   ;;  %v394_v3 = vld [vmem:[%s512_s1 + $0x28] sm:$0xff]  }
   0x2   :  { %354 = vmatprep.mubr.msk.bf16.mxu0 %vm406_vm0, %v405_v0  ;;  %366 = vmatprep.mubr.msk.bf16.mxu1 %vm406_vm0, %v405_v0  ;;  %v395_v4 = vld [vmem:[%s512_s1 + $0x20] sm:$0xff]   ;;  %v396_v5 = vld [vmem:[%s512_s1 + $0x18] sm:$0xff]   ;;  %v397_v6 = vld [vmem:[%s512_s1 + $0x10] sm:$0xff]  }
   0x3   :  { %339 = vmatpush3.bf16.msra.mxu0 %v392_v1  ;;  %382 = vmatpush3.bf16.msra.mxu1 %v392_v1  ;;  %v398_v7 = vld [vmem:[%s512_s1 + $0x8] sm:$0xff]   ;;  %v399_v8 = vld [vmem:[%s512_s1] sm:$0xff]   ;;  %v401_v10 = vld [vmem:[%s513_s0 + $0x18] sm:$0xff]  }
   0x4   :  { %340 = vmatprep.subr.bf16.mxu0 %v405_v0  ;;  %375 = vmatprep.subr.bf16.mxu1 %v405_v0  ;;  %v400_v9 = vld [vmem:[%s513_s0] sm:$0xff]   ;;  %v402_v11 = vld [vmem:[%s513_s0 + $0x8] sm:$0xff]   ;;  %v404_v13 = vld [vmem:[%s513_s0 + $0x10] sm:$0xff]  }
   0x5   :  { %v403_v12 = vld [vmem:[%s513_s0 + $0x20] sm:$0xff]  }
   0x6   :  { %v323_v15 = vld [vmem:[%s514_s2] ss:$0 sm:$0xff] }
   0x7   :  { %341 = vmatpush3.bf16.msra.mxu0 %v393_v2  ;;  %383 = vmatpush3.bf16.msra.mxu1 %v393_v2  ;;  %v324_v17 = vld [vmem:[%s515_s3] ss:$0 sm:$0xff] }
   0x8   :  { %342 = vmatprep.subr.bf16.mxu0 %v405_v0  ;;  %376 = vmatprep.subr.bf16.mxu1 %v405_v0 }
   0xb   :  { %343 = vmatpush3.bf16.msra.mxu0 %v394_v3  ;;  %384 = vmatpush3.bf16.msra.mxu1 %v394_v3 }
   0xc   :  { %344 = vmatprep.subr.bf16.mxu0 %v405_v0  ;;  %377 = vmatprep.subr.bf16.mxu1 %v405_v0 }
   0xf   :  { %345 = vmatpush3.bf16.msra.mxu0 %v395_v4  ;;  %385 = vmatpush3.bf16.msra.mxu1 %v395_v4 }
  0x10   :  { %346 = vmatprep.subr.bf16.mxu0 %v405_v0  ;;  %378 = vmatprep.subr.bf16.mxu1 %v405_v0 }
  0x13   :  { %347 = vmatpush3.bf16.msra.mxu0 %v396_v5  ;;  %386 = vmatpush3.bf16.msra.mxu1 %v396_v5 }
  0x14   :  { %348 = vmatprep.subr.bf16.mxu0 %v405_v0  ;;  %379 = vmatprep.subr.bf16.mxu1 %v405_v0 }
  0x17   :  { %349 = vmatpush3.bf16.msra.mxu0 %v397_v6  ;;  %387 = vmatpush3.bf16.msra.mxu1 %v397_v6 }
  0x18   :  { %350 = vmatprep.subr.bf16.mxu0 %v405_v0  ;;  %380 = vmatprep.subr.bf16.mxu1 %v405_v0 }
  0x1b   :  { %351 = vmatpush3.bf16.msra.mxu0 %v398_v7  ;;  %388 = vmatpush3.bf16.msra.mxu1 %v398_v7 }
  0x1c   :  { %352 = vmatprep.subr.bf16.mxu0 %v405_v0  ;;  %381 = vmatprep.subr.bf16.mxu1 %v405_v0 }
  0x1f   :  { %353 = vmatpush3.bf16.msra.mxu0 %v399_v8  ;;  %389 = vmatpush3.bf16.msra.mxu1 %v399_v8 }
  0x22   :  { %355 = vmatmul.mubr.bf16.vlgmr.msra.gmra.mxu0 %v400_v9  ;;  %367 = vmatmul.mubr.bf16.vlgmr.msra.gmra.mxu1 %v401_v10 }
  0x23   :  { %358 = vmatprep.mubr.msk.bf16.mxu0 %vm406_vm0, %v405_v0  ;;  %370 = vmatprep.mubr.msk.bf16.mxu1 %vm406_vm0, %v405_v0 }
  0x2a   :  { %359 = vmatmul.mubr.bf16.gmra.mxu0 %v402_v11  ;;  %371 = vmatmul.mubr.bf16.gmra.mxu1 %v403_v12 }
  0x2b   :  { %362 = vmatprep.mubr.msk.bf16.mxu0 %vm406_vm0, %v405_v0 }
  0x32   :  { %363 = vmatmul.mubr.bf16.gmra.mxu0 %v404_v13 }
  0xe2   :  { %v180_v14 = vpop.f32.mrf.mxu0  ;;  %v204_v16 = vpop.f32.mrf.mxu1 }
  0xe3   :  { %v259_v20 = vmul.f32 %v323_v15, %v180_v14  ;;  %v265_v21 = vmul.f32 %v323_v15, %v204_v16 }
  0xe4   :  { %v356_v18 = vpop.f32.mrf.mxu0  ;;  %v368_v19 = vpop.f32.mrf.mxu1 }
  0xe5   :  { %v276_v24 = vadd.f32 %v324_v17, %v259_v20  ;;  %v282_v25 = vadd.f32 %v324_v17, %v265_v21 }
  0xe6   :  { %v183_v22 = vpop.f32.mrf.mxu0  ;;  %v207_v23 = vpop.f32.mrf.mxu1 }
  0xe7   :  { %v286_v28 = vmax.f32 %v276_v24, 0.0  ;;  %v292_v29 = vmax.f32 %v282_v25, 0.0  ;;  %v260_v30 = vmul.f32 %v323_v15, %v183_v22  ;;  %v266_v31 = vmul.f32 %v323_v15, %v207_v23 }
  0xe8   :  { %v357_v26 = vpop.f32.mrf.mxu0  ;;  %v369_v27 = vpop.f32.mrf.mxu1 }
  0xe9   :  { %296 = vst [vmem:[%s516_s4] sm:$0xff] %v286_v28  ;;  %302 = vst [vmem:[%s516_s4 + $0x30] sm:$0xff] %v292_v29  ;;  %v277_v34 = vadd.f32 %v324_v17, %v260_v30  ;;  %v283_v35 = vadd.f32 %v324_v17, %v266_v31 }
  0xea   :  { %v188_v32 = vpop.f32.mrf.mxu0  ;;  %v212_v33 = vpop.f32.mrf.mxu1 }
  0xeb   :  { %v287_v38 = vmax.f32 %v277_v34, 0.0  ;;  %v293_v39 = vmax.f32 %v283_v35, 0.0  ;;  %v261_v40 = vmul.f32 %v323_v15, %v188_v32  ;;  %v267_v41 = vmul.f32 %v323_v15, %v212_v33 }
  0xec   :  { %v360_v36 = vpop.f32.mrf.mxu0  ;;  %v372_v37 = vpop.f32.mrf.mxu1 }
  0xed   :  { %297 = vst [vmem:[%s516_s4 + $0x8] sm:$0xff] %v287_v38  ;;  %303 = vst [vmem:[%s516_s4 + $0x38] sm:$0xff] %v293_v39  ;;  %v278_v44 = vadd.f32 %v324_v17, %v261_v40  ;;  %v284_v45 = vadd.f32 %v324_v17, %v267_v41 }
  0xee   :  { %v191_v42 = vpop.f32.mrf.mxu0  ;;  %v215_v43 = vpop.f32.mrf.mxu1 }
  0xef   :  { %v288_v48 = vmax.f32 %v278_v44, 0.0  ;;  %v294_v49 = vmax.f32 %v284_v45, 0.0  ;;  %v262_v50 = vmul.f32 %v323_v15, %v191_v42  ;;  %v268_v51 = vmul.f32 %v323_v15, %v215_v43 }
  0xf0   :  { %v361_v46 = vpop.f32.mrf.mxu0  ;;  %v373_v47 = vpop.f32.mrf.mxu1 }
  0xf1   :  { %298 = vst [vmem:[%s516_s4 + $0x10] sm:$0xff] %v288_v48  ;;  %304 = vst [vmem:[%s516_s4 + $0x40] sm:$0xff] %v294_v49  ;;  %v279_v53 = vadd.f32 %v324_v17, %v262_v50  ;;  %v285_v54 = vadd.f32 %v324_v17, %v268_v51 }
  0xf2   :  { %v196_v52 = vpop.f32.mrf.mxu0 }
  0xf3   :  { %v289_v56 = vmax.f32 %v279_v53, 0.0  ;;  %v295_v57 = vmax.f32 %v285_v54, 0.0  ;;  %v263_v58 = vmul.f32 %v323_v15, %v196_v52 }
  0xf4   :  { %v364_v55 = vpop.f32.mrf.mxu0 }
  0xf5   :  { %299 = vst [vmem:[%s516_s4 + $0x18] sm:$0xff] %v289_v56  ;;  %305 = vst [vmem:[%s516_s4 + $0x48] sm:$0xff] %v295_v57  ;;  %v280_v60 = vadd.f32 %v324_v17, %v263_v58 }
  0xf6   :  { %v199_v59 = vpop.f32.mrf.mxu0 }
  0xf7   :  { %v290_v62 = vmax.f32 %v280_v60, 0.0  ;;  %v264_v63 = vmul.f32 %v323_v15, %v199_v59 }
  0xf8   :  { %v365_v61 = vpop.f32.mrf.mxu0 }
  0xf9   :  { %300 = vst [vmem:[%s516_s4 + $0x20] sm:$0xff] %v290_v62  ;;  %v281_v0 = vadd.f32 %v324_v17, %v264_v63 }
  0xfb   :  { %v291_v1 = vmax.f32 %v281_v0, 0.0 }
  0xfd   :  { %301 = vst [vmem:[%s516_s4 + $0x28] sm:$0xff] %v291_v1 }

// kernel: generator_enc_forward.12
= control target key start
LH: loop header
LB: loop body
LE: loop exit
PB: predicated region body
PF: predicated region fallthrough
CT: control target
= control target key end

     0   :  { %s665_s1 = inlined_call_operand.vmem [shape: bf16[384,128], index: 1, kind: input, shape index: {}]   ;;  %s666_s0 = inlined_call_operand.vmem [shape: bf16[32,384], index: 0, kind: input, shape index: {}]   ;;  %s667_s2 = inlined_call_operand.vmem [shape: f32[1,128], index: 2, kind: input, shape index: {}]   ;;  %s668_s3 = inlined_call_operand.vmem [shape: f32[1,128], index: 3, kind: input, shape index: {}]   ;;  %s669_s4 = inlined_call_operand.vmem [shape: f32[32,128], index: 4, kind: output, shape index: {}]  }
   0x1   :  { %v500_v0 = vld [vmem:[%s665_s1 + $0x78] sm:$0xff]   ;;  %v503_v3 = vld [vmem:[%s665_s1 + $0x70] sm:$0xff]   ;;  %v506_v6 = vld [vmem:[%s665_s1 + $0x68] sm:$0xff]  }
   0x2   :  { %v501_v1 = vld [vmem:[%s665_s1 + $0x38] sm:$0xff]   ;;  %441 = vmatprep.subr.bf16.mxu0 %v500_v0  ;;  %v504_v4 = vld [vmem:[%s665_s1 + $0x30] sm:$0xff]   ;;  %v507_v7 = vld [vmem:[%s665_s1 + $0x28] sm:$0xff]  }
   0x3   :  { %v502_v2 = vld [vmem:[%s665_s1 + $0xb8] sm:$0xff]   ;;  %442 = vmatpush3.bf16.msra.mxu0 %v501_v1  ;;  %v505_v5 = vld [vmem:[%s665_s1 + $0xb0] sm:$0xff]   ;;  %v508_v8 = vld [vmem:[%s665_s1 + $0xa8] sm:$0xff]  }
   0x4   :  { %479 = vmatprep.subr.bf16.mxu1 %v502_v2  ;;  %443 = vmatprep.subr.bf16.mxu0 %v503_v3  ;;  %v509_v9 = vld [vmem:[%s665_s1 + $0x60] sm:$0xff]   ;;  %v512_v12 = vld [vmem:[%s665_s1 + $0x58] sm:$0xff]   ;;  %v515_v15 = vld [vmem:[%s665_s1 + $0x50] sm:$0xff]  }
   0x5   :  { %480 = vmatpush3.bf16.msra.mxu1 %v502_v2  ;;  %v510_v10 = vld [vmem:[%s665_s1 + $0x20] sm:$0xff]   ;;  %v514_v13 = vld [vmem:[%s665_s1 + $0x98] sm:$0xff]   ;;  %v517_v16 = vld [vmem:[%s665_s1 + $0x90] sm:$0xff]  }
   0x6   :  { %481 = vmatprep.subr.bf16.mxu1 %v505_v5  ;;  %v511_v11 = vld [vmem:[%s665_s1 + $0xa0] sm:$0xff]   ;;  %v513_v14 = vld [vmem:[%s665_s1 + $0x18] sm:$0xff]   ;;  %v516_v17 = vld [vmem:[%s665_s1 + $0x10] sm:$0xff]  }
   0x7   :  { %444 = vmatpush3.bf16.msra.mxu0 %v504_v4  ;;  %v518_v18 = vld [vmem:[%s665_s1 + $0x48] sm:$0xff]   ;;  %v521_v21 = vld [vmem:[%s665_s1 + $0x40] sm:$0xff]  }
   0x8   :  { %445 = vmatprep.subr.bf16.mxu0 %v506_v6  ;;  %v519_v19 = vld [vmem:[%s665_s1 + $0x8] sm:$0xff]   ;;  %v523_v22 = vld [vmem:[%s665_s1 + $0x80] sm:$0xff]  }
   0x9   :  { %482 = vmatpush3.bf16.msra.mxu1 %v505_v5  ;;  %v520_v20 = vld [vmem:[%s665_s1 + $0x88] sm:$0xff]   ;;  %v526_v23 = vld [vmem:[%s666_s0 + $0x4] ss:$12 sps:$4 sm:$0xff]   ;;  %v439_v37 = vld [vmem:[%s667_s2] ss:$0 sm:$0xff] }
   0xa   :  { %483 = vmatprep.subr.bf16.mxu1 %v508_v8  ;;  %v527_v24 = vld [vmem:[%s666_s0 + $0x8] ss:$12 sps:$4 sm:$0xff]   ;;  %v522_v25 = vld [vmem:[%s665_s1] sm:$0xff]   ;;  %294 = vmatprep.mubr.bf16.mxu0 %v526_v23 }
   0xb   :  { %446 = vmatpush3.bf16.msra.mxu0 %v507_v7  ;;  %495 = vmatprep.mubr.bf16.mxu1 %v527_v24  ;;  %v524_v26 = vld [vmem:[%s666_s0] ss:$12 sps:$4 sm:$0xff]   ;;  %v529_v27 = vld [vmem:[%s666_s0 + $0x1c] ss:$12 sps:$4 sm:$0xff]   ;;  %v531_v29 = vld [vmem:[%s666_s0 + $0x18] ss:$12 sps:$4 sm:$0xff]  }
   0xc   :  { %447 = vmatprep.subr.bf16.mxu0 %v509_v9  ;;  %v528_v28 = vld [vmem:[%s666_s0 + $0x20] ss:$12 sps:$4 sm:$0xff]  }
   0xd   :  { %484 = vmatpush3.bf16.msra.mxu1 %v508_v8  ;;  %v440_v41 = vld [vmem:[%s668_s3] ss:$0 sm:$0xff] }
   0xe   :  { %485 = vmatprep.subr.bf16.mxu1 %v511_v11 }
   0xf   :  { %448 = vmatpush3.bf16.msra.mxu0 %v510_v10 }
  0x10   :  { %449 = vmatprep.subr.bf16.mxu0 %v512_v12 }
  0x11   :  { %486 = vmatpush3.bf16.msra.mxu1 %v511_v11 }
  0x12   :  { %487 = vmatprep.subr.bf16.mxu1 %v514_v13 }
  0x13   :  { %450 = vmatpush3.bf16.msra.mxu0 %v513_v14 }
  0x14   :  { %451 = vmatprep.subr.bf16.mxu0 %v515_v15 }
  0x15   :  { %488 = vmatpush3.bf16.msra.mxu1 %v514_v13 }
  0x16   :  { %489 = vmatprep.subr.bf16.mxu1 %v517_v16 }
  0x17   :  { %452 = vmatpush3.bf16.msra.mxu0 %v516_v17 }
  0x18   :  { %453 = vmatprep.subr.bf16.mxu0 %v518_v18 }
  0x19   :  { %490 = vmatpush3.bf16.msra.mxu1 %v517_v16 }
  0x1a   :  { %491 = vmatprep.subr.bf16.mxu1 %v520_v20 }
  0x1b   :  { %454 = vmatpush3.bf16.msra.mxu0 %v519_v19 }
  0x1c   :  { %455 = vmatprep.subr.bf16.mxu0 %v521_v21 }
  0x1d   :  { %492 = vmatpush3.bf16.msra.mxu1 %v520_v20 }
  0x1e   :  { %493 = vmatprep.subr.bf16.mxu1 %v523_v22 }
  0x1f   :  { %456 = vmatpush3.bf16.msra.mxu0 %v522_v25 }
  0x21   :  { %494 = vmatpush3.bf16.msra.mxu1 %v523_v22 }
  0x22   :  { %295 = vmatmul.mubr.bf16.vlgmr.msra.gmra.mxu0 %v524_v26 }
  0x23   :  { %302 = vmatprep.mubr.bf16.mxu0 %v529_v27 }
  0x24   :  { %496 = vmatmul.mubr.bf16.vlgmr.msra.gmra.mxu1 %v528_v28 }
  0x2a   :  { %303 = vmatmul.mubr.bf16.gmra.mxu0 %v531_v29 }
  0xe2   :  { %v457_v30 = vpop.f32.mrf.mxu0 }
  0xe4   :  { %v458_v31 = vpop.f32.mrf.mxu0  ;;  %v497_v32 = vpop.f32.mrf.mxu1 }
  0xe5   :  { %v459_v33 = vadd.f32 %v458_v31, %v457_v30 }
  0xe6   :  { %v460_v34 = vpop.f32.mrf.mxu0  ;;  %v345_v35 = vpop.f32.mrf.mxu1 }
  0xe7   :  { %v346_v36 = vadd.f32 %v459_v33, %v345_v35 }
  0xe8   :  { %v461_v38 = vpop.f32.mrf.mxu0  ;;  %v498_v39 = vpop.f32.mrf.mxu1 }
  0xe9   :  { %v462_v40 = vadd.f32 %v461_v38, %v460_v34  ;;  %v382_v44 = vmul.f32 %v439_v37, %v346_v36 }
  0xea   :  { %v463_v42 = vpop.f32.mrf.mxu0  ;;  %v348_v43 = vpop.f32.mrf.mxu1 }
  0xeb   :  { %v349_v45 = vadd.f32 %v462_v40, %v348_v43  ;;  %v393_v47 = vadd.f32 %v440_v41, %v382_v44 }
  0xec   :  { %v464_v46 = vpop.f32.mrf.mxu0 }
  0xed   :  { %v465_v48 = vadd.f32 %v464_v46, %v463_v42  ;;  %v397_v50 = vmax.f32 %v393_v47, 0.0  ;;  %v383_v51 = vmul.f32 %v439_v37, %v349_v45 }
  0xee   :  { %v466_v49 = vpop.f32.mrf.mxu0 }
  0xef   :  { %v354_v52 = vadd.f32 %v497_v32, %v465_v48  ;;  %401 = vst [vmem:[%s669_s4] sm:$0xff] %v397_v50  ;;  %v394_v54 = vadd.f32 %v440_v41, %v383_v51 }
  0xf0   :  { %v467_v53 = vpop.f32.mrf.mxu0 }
  0xf1   :  { %v468_v55 = vadd.f32 %v467_v53, %v466_v49  ;;  %v398_v56 = vmax.f32 %v394_v54, 0.0  ;;  %v384_v57 = vmul.f32 %v439_v37, %v354_v52 }
  0xf3   :  { %v357_v58 = vadd.f32 %v498_v39, %v468_v55  ;;  %402 = vst [vmem:[%s669_s4 + $0x8] sm:$0xff] %v398_v56  ;;  %v395_v59 = vadd.f32 %v440_v41, %v384_v57 }
  0xf5   :  { %v399_v60 = vmax.f32 %v395_v59, 0.0  ;;  %v385_v61 = vmul.f32 %v439_v37, %v357_v58 }
  0xf7   :  { %403 = vst [vmem:[%s669_s4 + $0x10] sm:$0xff] %v399_v60  ;;  %v396_v62 = vadd.f32 %v440_v41, %v385_v61 }
  0xf9   :  { %v400_v63 = vmax.f32 %v396_v62, 0.0 }
  0xfb   :  { %404 = vst [vmem:[%s669_s4 + $0x18] sm:$0xff] %v400_v63 }

// kernel: generator_enc_forward.11
= control target key start
LH: loop header
LB: loop body
LE: loop exit
PB: predicated region body
PF: predicated region fallthrough
CT: control target
= control target key end

     0   :  { %s472_s1 = inlined_call_operand.vmem [shape: bf16[256,128], index: 1, kind: input, shape index: {}]   ;;  %s473_s0 = inlined_call_operand.vmem [shape: bf16[32,256], index: 0, kind: input, shape index: {}]   ;;  %s474_s2 = inlined_call_operand.vmem [shape: f32[1,128], index: 2, kind: input, shape index: {}]   ;;  %s475_s3 = inlined_call_operand.vmem [shape: f32[1,128], index: 3, kind: input, shape index: {}]   ;;  %s476_s4 = inlined_call_operand.vmem [shape: f32[32,128], index: 4, kind: output, shape index: {}]  }
   0x1   :  { %v347_v0 = vld [vmem:[%s472_s1 + $0x78] sm:$0xff]   ;;  %v349_v2 = vld [vmem:[%s472_s1 + $0x70] sm:$0xff]   ;;  %v351_v4 = vld [vmem:[%s472_s1 + $0x68] sm:$0xff]  }
   0x2   :  { %v348_v1 = vld [vmem:[%s472_s1 + $0x38] sm:$0xff]   ;;  %302 = vmatprep.subr.bf16.mxu0 %v347_v0  ;;  %330 = vmatprep.subr.bf16.mxu1 %v347_v0  ;;  %v350_v3 = vld [vmem:[%s472_s1 + $0x30] sm:$0xff]   ;;  %v352_v5 = vld [vmem:[%s472_s1 + $0x28] sm:$0xff]  }
   0x3   :  { %303 = vmatpush3.bf16.msra.mxu0 %v348_v1  ;;  %338 = vmatpush3.bf16.msra.mxu1 %v348_v1  ;;  %v353_v6 = vld [vmem:[%s472_s1 + $0x60] sm:$0xff]   ;;  %v355_v8 = vld [vmem:[%s472_s1 + $0x58] sm:$0xff]   ;;  %v357_v10 = vld [vmem:[%s472_s1 + $0x50] sm:$0xff]  }
   0x4   :  { %304 = vmatprep.subr.bf16.mxu0 %v349_v2  ;;  %331 = vmatprep.subr.bf16.mxu1 %v349_v2  ;;  %v354_v7 = vld [vmem:[%s472_s1 + $0x20] sm:$0xff]   ;;  %v356_v9 = vld [vmem:[%s472_s1 + $0x18] sm:$0xff]   ;;  %v358_v13 = vld [vmem:[%s472_s1 + $0x10] sm:$0xff]  }
   0x5   :  { %v365_v11 = vld [vmem:[%s473_s0 + $0x4] ss:$8 sps:$4 sm:$0xff]   ;;  %v368_v12 = vld [vmem:[%s473_s0 + $0x14] ss:$8 sps:$4 sm:$0xff]   ;;  %v363_v18 = vld [vmem:[%s473_s0] ss:$8 sps:$4 sm:$0xff]  }
   0x6   :  { %v359_v14 = vld [vmem:[%s472_s1 + $0x48] sm:$0xff]   ;;  %214 = vmatprep.mubr.bf16.mxu0 %v365_v11  ;;  %222 = vmatprep.mubr.bf16.mxu1 %v368_v12  ;;  %v361_v16 = vld [vmem:[%s472_s1 + $0x40] sm:$0xff]   ;;  %v366_v19 = vld [vmem:[%s473_s0 + $0x10] ss:$8 sps:$4 sm:$0xff]  }
   0x7   :  { %305 = vmatpush3.bf16.msra.mxu0 %v350_v3  ;;  %339 = vmatpush3.bf16.msra.mxu1 %v350_v3  ;;  %v360_v15 = vld [vmem:[%s472_s1 + $0x8] sm:$0xff]   ;;  %v362_v17 = vld [vmem:[%s472_s1] sm:$0xff]  }
   0x8   :  { %306 = vmatprep.subr.bf16.mxu0 %v351_v4  ;;  %332 = vmatprep.subr.bf16.mxu1 %v351_v4  ;;  %v300_v26 = vld [vmem:[%s474_s2] ss:$0 sm:$0xff] }
   0x9   :  { %v301_v29 = vld [vmem:[%s475_s3] ss:$0 sm:$0xff] }
   0xb   :  { %307 = vmatpush3.bf16.msra.mxu0 %v352_v5  ;;  %340 = vmatpush3.bf16.msra.mxu1 %v352_v5 }
   0xc   :  { %308 = vmatprep.subr.bf16.mxu0 %v353_v6  ;;  %333 = vmatprep.subr.bf16.mxu1 %v353_v6 }
   0xf   :  { %309 = vmatpush3.bf16.msra.mxu0 %v354_v7  ;;  %341 = vmatpush3.bf16.msra.mxu1 %v354_v7 }
  0x10   :  { %310 = vmatprep.subr.bf16.mxu0 %v355_v8  ;;  %334 = vmatprep.subr.bf16.mxu1 %v355_v8 }
  0x13   :  { %311 = vmatpush3.bf16.msra.mxu0 %v356_v9  ;;  %342 = vmatpush3.bf16.msra.mxu1 %v356_v9 }
  0x14   :  { %312 = vmatprep.subr.bf16.mxu0 %v357_v10  ;;  %335 = vmatprep.subr.bf16.mxu1 %v357_v10 }
  0x17   :  { %313 = vmatpush3.bf16.msra.mxu0 %v358_v13  ;;  %343 = vmatpush3.bf16.msra.mxu1 %v358_v13 }
  0x18   :  { %314 = vmatprep.subr.bf16.mxu0 %v359_v14  ;;  %336 = vmatprep.subr.bf16.mxu1 %v359_v14 }
  0x1b   :  { %315 = vmatpush3.bf16.msra.mxu0 %v360_v15  ;;  %344 = vmatpush3.bf16.msra.mxu1 %v360_v15 }
  0x1c   :  { %316 = vmatprep.subr.bf16.mxu0 %v361_v16  ;;  %337 = vmatprep.subr.bf16.mxu1 %v361_v16 }
  0x1f   :  { %317 = vmatpush3.bf16.msra.mxu0 %v362_v17  ;;  %345 = vmatpush3.bf16.msra.mxu1 %v362_v17 }
  0x22   :  { %215 = vmatmul.mubr.bf16.vlgmr.msra.gmra.mxu0 %v363_v18  ;;  %223 = vmatmul.mubr.bf16.vlgmr.msra.gmra.mxu1 %v366_v19 }
  0xe2   :  { %v318_v20 = vpop.f32.mrf.mxu0  ;;  %v324_v21 = vpop.f32.mrf.mxu1 }
  0xe4   :  { %v319_v22 = vpop.f32.mrf.mxu0  ;;  %v325_v23 = vpop.f32.mrf.mxu1 }
  0xe5   :  { %v320_v24 = vadd.f32 %v319_v22, %v318_v20  ;;  %v326_v25 = vadd.f32 %v325_v23, %v324_v21 }
  0xe6   :  { %v321_v27 = vpop.f32.mrf.mxu0  ;;  %v327_v28 = vpop.f32.mrf.mxu1 }
  0xe7   :  { %v253_v32 = vmul.f32 %v320_v24, %v300_v26  ;;  %v255_v33 = vmul.f32 %v326_v25, %v300_v26 }
  0xe8   :  { %v322_v30 = vpop.f32.mrf.mxu0  ;;  %v328_v31 = vpop.f32.mrf.mxu1 }
  0xe9   :  { %v323_v34 = vadd.f32 %v322_v30, %v321_v27  ;;  %v329_v35 = vadd.f32 %v328_v31, %v327_v28  ;;  %v264_v36 = vadd.f32 %v301_v29, %v253_v32  ;;  %v266_v37 = vadd.f32 %v301_v29, %v255_v33 }
  0xeb   :  { %v268_v38 = vmax.f32 %v264_v36, 0.0  ;;  %v270_v39 = vmax.f32 %v266_v37, 0.0  ;;  %v254_v40 = vmul.f32 %v323_v34, %v300_v26  ;;  %v256_v41 = vmul.f32 %v329_v35, %v300_v26 }
  0xed   :  { %272 = vst [vmem:[%s476_s4] sm:$0xff] %v268_v38  ;;  %274 = vst [vmem:[%s476_s4 + $0x10] sm:$0xff] %v270_v39  ;;  %v265_v42 = vadd.f32 %v301_v29, %v254_v40  ;;  %v267_v43 = vadd.f32 %v301_v29, %v256_v41 }
  0xef   :  { %v269_v44 = vmax.f32 %v265_v42, 0.0  ;;  %v271_v45 = vmax.f32 %v267_v43, 0.0 }
  0xf1   :  { %273 = vst [vmem:[%s476_s4 + $0x8] sm:$0xff] %v269_v44  ;;  %275 = vst [vmem:[%s476_s4 + $0x18] sm:$0xff] %v271_v45 }

// kernel: generator_enc_forward.13
= control target key start
LH: loop header
LB: loop body
LE: loop exit
PB: predicated region body
PF: predicated region fallthrough
CT: control target
= control target key end

     0   :  { %s689_s1 = inlined_call_operand.vmem [shape: bf16[384,128], index: 1, kind: input, shape index: {}]   ;;  %s690_s0 = inlined_call_operand.vmem [shape: bf16[32,384], index: 0, kind: input, shape index: {}]   ;;  %s691_s2 = inlined_call_operand.vmem [shape: f32[1,128], index: 2, kind: input, shape index: {}]   ;;  %s692_s3 = inlined_call_operand.vmem [shape: f32[1,128], index: 3, kind: input, shape index: {}]   ;;  %s693_s4 = inlined_call_operand.vmem [shape: f32[32,128], index: 4, kind: input, shape index: {}]   ;;  %s694_s5 = inlined_call_operand.vmem [shape: f32[32,128], index: 5, kind: output, shape index: {}]  }
   0x1   :  { %v507_v0 = vld [vmem:[%s689_s1 + $0x78] sm:$0xff]   ;;  %v510_v3 = vld [vmem:[%s689_s1 + $0x70] sm:$0xff]   ;;  %v513_v6 = vld [vmem:[%s689_s1 + $0x68] sm:$0xff]  }
   0x2   :  { %v508_v1 = vld [vmem:[%s689_s1 + $0x38] sm:$0xff]   ;;  %448 = vmatprep.subr.bf16.mxu0 %v507_v0  ;;  %v511_v4 = vld [vmem:[%s689_s1 + $0x30] sm:$0xff]   ;;  %v514_v7 = vld [vmem:[%s689_s1 + $0x28] sm:$0xff]  }
   0x3   :  { %v509_v2 = vld [vmem:[%s689_s1 + $0xb8] sm:$0xff]   ;;  %449 = vmatpush3.bf16.msra.mxu0 %v508_v1  ;;  %v512_v5 = vld [vmem:[%s689_s1 + $0xb0] sm:$0xff]   ;;  %v515_v8 = vld [vmem:[%s689_s1 + $0xa8] sm:$0xff]  }
   0x4   :  { %486 = vmatprep.subr.bf16.mxu1 %v509_v2  ;;  %450 = vmatprep.subr.bf16.mxu0 %v510_v3  ;;  %v516_v9 = vld [vmem:[%s689_s1 + $0x60] sm:$0xff]   ;;  %v519_v12 = vld [vmem:[%s689_s1 + $0x58] sm:$0xff]   ;;  %v522_v15 = vld [vmem:[%s689_s1 + $0x50] sm:$0xff]  }
   0x5   :  { %487 = vmatpush3.bf16.msra.mxu1 %v509_v2  ;;  %v517_v10 = vld [vmem:[%s689_s1 + $0x20] sm:$0xff]   ;;  %v521_v13 = vld [vmem:[%s689_s1 + $0x98] sm:$0xff]   ;;  %v524_v16 = vld [vmem:[%s689_s1 + $0x90] sm:$0xff]  }
   0x6   :  { %488 = vmatprep.subr.bf16.mxu1 %v512_v5  ;;  %v518_v11 = vld [vmem:[%s689_s1 + $0xa0] sm:$0xff]   ;;  %v520_v14 = vld [vmem:[%s689_s1 + $0x18] sm:$0xff]   ;;  %v523_v17 = vld [vmem:[%s689_s1 + $0x10] sm:$0xff]  }
   0x7   :  { %451 = vmatpush3.bf16.msra.mxu0 %v511_v4  ;;  %v525_v18 = vld [vmem:[%s689_s1 + $0x48] sm:$0xff]   ;;  %v528_v21 = vld [vmem:[%s689_s1 + $0x40] sm:$0xff]   ;;  %v402_v61 = vld [vmem:[%s693_s4 + $0x10] sm:$0xff] }
   0x8   :  { %452 = vmatprep.subr.bf16.mxu0 %v513_v6  ;;  %v526_v19 = vld [vmem:[%s689_s1 + $0x8] sm:$0xff]   ;;  %v530_v22 = vld [vmem:[%s689_s1 + $0x80] sm:$0xff]   ;;  %v403_v1 = vld [vmem:[%s693_s4 + $0x18] sm:$0xff] }
   0x9   :  { %489 = vmatpush3.bf16.msra.mxu1 %v512_v5  ;;  %v527_v20 = vld [vmem:[%s689_s1 + $0x88] sm:$0xff]   ;;  %v533_v23 = vld [vmem:[%s690_s0 + $0x4] ss:$12 sps:$4 sm:$0xff]   ;;  %v446_v37 = vld [vmem:[%s691_s2] ss:$0 sm:$0xff] }
   0xa   :  { %490 = vmatprep.subr.bf16.mxu1 %v515_v8  ;;  %v534_v24 = vld [vmem:[%s690_s0 + $0x8] ss:$12 sps:$4 sm:$0xff]   ;;  %v529_v25 = vld [vmem:[%s689_s1] sm:$0xff]   ;;  %297 = vmatprep.mubr.bf16.mxu0 %v533_v23 }
   0xb   :  { %453 = vmatpush3.bf16.msra.mxu0 %v514_v7  ;;  %502 = vmatprep.mubr.bf16.mxu1 %v534_v24  ;;  %v531_v26 = vld [vmem:[%s690_s0] ss:$12 sps:$4 sm:$0xff]   ;;  %v536_v27 = vld [vmem:[%s690_s0 + $0x1c] ss:$12 sps:$4 sm:$0xff]   ;;  %v538_v29 = vld [vmem:[%s690_s0 + $0x18] ss:$12 sps:$4 sm:$0xff]  }
   0xc   :  { %454 = vmatprep.subr.bf16.mxu0 %v516_v9  ;;  %v535_v28 = vld [vmem:[%s690_s0 + $0x20] ss:$12 sps:$4 sm:$0xff]  }
   0xd   :  { %491 = vmatpush3.bf16.msra.mxu1 %v515_v8  ;;  %v447_v41 = vld [vmem:[%s692_s3] ss:$0 sm:$0xff]  ;;  %v401_v54 = vld [vmem:[%s693_s4 + $0x8] sm:$0xff] }
   0xe   :  { %492 = vmatprep.subr.bf16.mxu1 %v518_v11  ;;  %v400_v46 = vld [vmem:[%s693_s4] sm:$0xff] }
   0xf   :  { %455 = vmatpush3.bf16.msra.mxu0 %v517_v10 }
  0x10   :  { %456 = vmatprep.subr.bf16.mxu0 %v519_v12 }
  0x11   :  { %493 = vmatpush3.bf16.msra.mxu1 %v518_v11 }
  0x12   :  { %494 = vmatprep.subr.bf16.mxu1 %v521_v13 }
  0x13   :  { %457 = vmatpush3.bf16.msra.mxu0 %v520_v14 }
  0x14   :  { %458 = vmatprep.subr.bf16.mxu0 %v522_v15 }
  0x15   :  { %495 = vmatpush3.bf16.msra.mxu1 %v521_v13 }
  0x16   :  { %496 = vmatprep.subr.bf16.mxu1 %v524_v16 }
  0x17   :  { %459 = vmatpush3.bf16.msra.mxu0 %v523_v17 }
  0x18   :  { %460 = vmatprep.subr.bf16.mxu0 %v525_v18 }
  0x19   :  { %497 = vmatpush3.bf16.msra.mxu1 %v524_v16 }
  0x1a   :  { %498 = vmatprep.subr.bf16.mxu1 %v527_v20 }
  0x1b   :  { %461 = vmatpush3.bf16.msra.mxu0 %v526_v19 }
  0x1c   :  { %462 = vmatprep.subr.bf16.mxu0 %v528_v21 }
  0x1d   :  { %499 = vmatpush3.bf16.msra.mxu1 %v527_v20 }
  0x1e   :  { %500 = vmatprep.subr.bf16.mxu1 %v530_v22 }
  0x1f   :  { %463 = vmatpush3.bf16.msra.mxu0 %v529_v25 }
  0x21   :  { %501 = vmatpush3.bf16.msra.mxu1 %v530_v22 }
  0x22   :  { %298 = vmatmul.mubr.bf16.vlgmr.msra.gmra.mxu0 %v531_v26 }
  0x23   :  { %305 = vmatprep.mubr.bf16.mxu0 %v536_v27 }
  0x24   :  { %503 = vmatmul.mubr.bf16.vlgmr.msra.gmra.mxu1 %v535_v28 }
  0x2a   :  { %306 = vmatmul.mubr.bf16.gmra.mxu0 %v538_v29 }
  0xe2   :  { %v464_v30 = vpop.f32.mrf.mxu0 }
  0xe4   :  { %v465_v31 = vpop.f32.mrf.mxu0  ;;  %v504_v32 = vpop.f32.mrf.mxu1 }
  0xe5   :  { %v466_v33 = vadd.f32 %v465_v31, %v464_v30 }
  0xe6   :  { %v467_v34 = vpop.f32.mrf.mxu0  ;;  %v348_v35 = vpop.f32.mrf.mxu1 }
  0xe7   :  { %v349_v36 = vadd.f32 %v466_v33, %v348_v35 }
  0xe8   :  { %v468_v38 = vpop.f32.mrf.mxu0  ;;  %v505_v39 = vpop.f32.mrf.mxu1 }
  0xe9   :  { %v469_v40 = vadd.f32 %v468_v38, %v467_v34  ;;  %v385_v44 = vmul.f32 %v446_v37, %v349_v36 }
  0xea   :  { %v470_v42 = vpop.f32.mrf.mxu0  ;;  %v351_v43 = vpop.f32.mrf.mxu1 }
  0xeb   :  { %v352_v45 = vadd.f32 %v469_v40, %v351_v43  ;;  %v396_v48 = vadd.f32 %v447_v41, %v385_v44 }
  0xec   :  { %v471_v47 = vpop.f32.mrf.mxu0 }
  0xed   :  { %v472_v49 = vadd.f32 %v471_v47, %v470_v42  ;;  %v404_v51 = vadd.f32 %v400_v46, %v396_v48  ;;  %v386_v52 = vmul.f32 %v446_v37, %v352_v45 }
  0xee   :  { %v473_v50 = vpop.f32.mrf.mxu0 }
  0xef   :  { %v357_v53 = vadd.f32 %v504_v32, %v472_v49  ;;  %408 = vst [vmem:[%s694_s5] sm:$0xff] %v404_v51  ;;  %v397_v56 = vadd.f32 %v447_v41, %v386_v52 }
  0xf0   :  { %v474_v55 = vpop.f32.mrf.mxu0 }
  0xf1   :  { %v475_v57 = vadd.f32 %v474_v55, %v473_v50  ;;  %v405_v58 = vadd.f32 %v401_v54, %v397_v56  ;;  %v387_v59 = vmul.f32 %v446_v37, %v357_v53 }
  0xf3   :  { %v360_v60 = vadd.f32 %v505_v39, %v475_v57  ;;  %409 = vst [vmem:[%s694_s5 + $0x8] sm:$0xff] %v405_v58  ;;  %v398_v62 = vadd.f32 %v447_v41, %v387_v59 }
  0xf5   :  { %v406_v63 = vadd.f32 %v402_v61, %v398_v62  ;;  %v388_v0 = vmul.f32 %v446_v37, %v360_v60 }
  0xf7   :  { %410 = vst [vmem:[%s694_s5 + $0x10] sm:$0xff] %v406_v63  ;;  %v399_v2 = vadd.f32 %v447_v41, %v388_v0 }
  0xf9   :  { %v407_v3 = vadd.f32 %v403_v1, %v399_v2 }
  0xfb   :  { %411 = vst [vmem:[%s694_s5 + $0x18] sm:$0xff] %v407_v3 }

// kernel: generator_enc_forward.14
= control target key start
LH: loop header
LB: loop body
LE: loop exit
PB: predicated region body
PF: predicated region fallthrough
CT: control target
= control target key end

     0   :  { %v1014_v1 = vmov 0   ;;  %vm1016_vm0 = vmmov 0   ;;  %s1295_s1 = inlined_call_operand.vmem [shape: bf16[384,384], index: 1, kind: input, shape index: {}]   ;;  %s1296_s0 = inlined_call_operand.vmem [shape: bf16[16,384], index: 0, kind: input, shape index: {}]   ;;  %s1297_s2 = inlined_call_operand.vmem [shape: f32[1,384], index: 2, kind: input, shape index: {}]   ;;  %s1298_s3 = inlined_call_operand.vmem [shape: f32[1,384], index: 3, kind: input, shape index: {}]   ;;  %s1299_s4 = inlined_call_operand.vmem [shape: f32[16,384], index: 4, kind: output, shape index: {}]  }
   0x1   :  { %v914_v0 = vld [vmem:[%s1295_s1 + $0xac] ss:$12 sps:$4 sm:$0xff]   ;;  %609 = vmatprep.mubr.bf16.mxu1 %v1014_v1  ;;  %v916_v2 = vld [vmem:[%s1295_s1 + $0xa8] ss:$12 sps:$4 sm:$0xff]   ;;  %v919_v4 = vld [vmem:[%s1295_s1 + $0x90] ss:$12 sps:$4 sm:$0xff]  }
   0x2   :  { %534 = vmatprep.subr.bf16.mxu0 %v914_v0  ;;  %v917_v3 = vld [vmem:[%s1295_s1 + $0x94] ss:$12 sps:$4 sm:$0xff]   ;;  %v920_v5 = vld [vmem:[%s1295_s1 + $0x7c] ss:$12 sps:$4 sm:$0xff]   ;;  %v922_v6 = vld [vmem:[%s1295_s1 + $0x78] ss:$12 sps:$4 sm:$0xff]  }
   0x3   :  { %535 = vmatpush1.bf16.msra.mxu0 %v916_v2  ;;  %v923_v7 = vld [vmem:[%s1295_s1 + $0x64] ss:$12 sps:$4 sm:$0xff]   ;;  %v932_v8 = vld [vmem:[%s1295_s1 + $0x22c] ss:$12 sps:$4 sm:$0xff]   ;;  %v934_v9 = vld [vmem:[%s1295_s1 + $0x228] ss:$12 sps:$4 sm:$0xff]  }
   0x4   :  { %536 = vmatprep.subr.bf16.mxu0 %v917_v3  ;;  %v925_v10 = vld [vmem:[%s1295_s1 + $0x60] ss:$12 sps:$4 sm:$0xff]   ;;  %577 = vmatprep.subr.bf16.mxu1 %v932_v8  ;;  %v940_v12 = vld [vmem:[%s1295_s1 + $0x210] ss:$12 sps:$4 sm:$0xff]   ;;  %v928_v14 = vld [vmem:[%s1295_s1 + $0x48] ss:$12 sps:$4 sm:$0xff]  }
   0x5   :  { %578 = vmatpush1.bf16.msra.mxu1 %v934_v9  ;;  %v938_v11 = vld [vmem:[%s1295_s1 + $0x214] ss:$12 sps:$4 sm:$0xff]   ;;  %v926_v13 = vld [vmem:[%s1295_s1 + $0x4c] ss:$12 sps:$4 sm:$0xff]   ;;  %v944_v15 = vld [vmem:[%s1295_s1 + $0x1fc] ss:$12 sps:$4 sm:$0xff]  }
   0x6   :  { %579 = vmatprep.subr.bf16.mxu1 %v938_v11  ;;  %v929_v16 = vld [vmem:[%s1295_s1 + $0x34] ss:$12 sps:$4 sm:$0xff]   ;;  %v946_v17 = vld [vmem:[%s1295_s1 + $0x1f8] ss:$12 sps:$4 sm:$0xff]   ;;  %v931_v19 = vld [vmem:[%s1295_s1 + $0x30] ss:$12 sps:$4 sm:$0xff]  }
   0x7   :  { %537 = vmatpush1.bf16.msra.mxu0 %v919_v4  ;;  %v950_v18 = vld [vmem:[%s1295_s1 + $0x1e4] ss:$12 sps:$4 sm:$0xff]   ;;  %v935_v20 = vld [vmem:[%s1295_s1 + $0x1c] ss:$12 sps:$4 sm:$0xff]   ;;  %v952_v21 = vld [vmem:[%s1295_s1 + $0x1e0] ss:$12 sps:$4 sm:$0xff]  }
   0x8   :  { %538 = vmatprep.subr.bf16.mxu0 %v920_v5  ;;  %v956_v22 = vld [vmem:[%s1295_s1 + $0x1cc] ss:$12 sps:$4 sm:$0xff]   ;;  %v941_v24 = vld [vmem:[%s1295_s1 + $0x4] ss:$12 sps:$4 sm:$0xff]   ;;  %v958_v25 = vld [vmem:[%s1295_s1 + $0x1c8] ss:$12 sps:$4 sm:$0xff]  }
   0x9   :  { %580 = vmatpush1.bf16.msra.mxu1 %v940_v12  ;;  %v937_v23 = vld [vmem:[%s1295_s1 + $0x18] ss:$12 sps:$4 sm:$0xff]   ;;  %v962_v26 = vld [vmem:[%s1295_s1 + $0x1b4] ss:$12 sps:$4 sm:$0xff]   ;;  %v964_v29 = vld [vmem:[%s1295_s1 + $0x1b0] ss:$12 sps:$4 sm:$0xff]  }
   0xa   :  { %581 = vmatprep.subr.bf16.mxu1 %v944_v15  ;;  %v943_v27 = vld [vmem:[%s1295_s1] ss:$12 sps:$4 sm:$0xff]   ;;  %v968_v30 = vld [vmem:[%s1295_s1 + $0x19c] ss:$12 sps:$4 sm:$0xff]   ;;  %v970_v33 = vld [vmem:[%s1295_s1 + $0x198] ss:$12 sps:$4 sm:$0xff]  }
   0xb   :  { %539 = vmatpush1.bf16.msra.mxu0 %v922_v6  ;;  %v947_v28 = vld [vmem:[%s1295_s1 + $0x16c] ss:$12 sps:$4 sm:$0xff]   ;;  %v949_v31 = vld [vmem:[%s1295_s1 + $0x168] ss:$12 sps:$4 sm:$0xff]   ;;  %v974_v34 = vld [vmem:[%s1295_s1 + $0x184] ss:$12 sps:$4 sm:$0xff]  }
   0xc   :  { %540 = vmatprep.subr.bf16.mxu0 %v923_v7  ;;  %v953_v32 = vld [vmem:[%s1295_s1 + $0x154] ss:$12 sps:$4 sm:$0xff]   ;;  %v955_v35 = vld [vmem:[%s1295_s1 + $0x150] ss:$12 sps:$4 sm:$0xff]   ;;  %v961_v39 = vld [vmem:[%s1295_s1 + $0x138] ss:$12 sps:$4 sm:$0xff]  }
   0xd   :  { %582 = vmatpush1.bf16.msra.mxu1 %v946_v17  ;;  %v976_v36 = vld [vmem:[%s1295_s1 + $0x180] ss:$12 sps:$4 sm:$0xff]   ;;  %v959_v37 = vld [vmem:[%s1295_s1 + $0x13c] ss:$12 sps:$4 sm:$0xff]   ;;  %v965_v41 = vld [vmem:[%s1295_s1 + $0x124] ss:$12 sps:$4 sm:$0xff]  }
   0xe   :  { %583 = vmatprep.subr.bf16.mxu1 %v950_v18  ;;  %v980_v38 = vld [vmem:[%s1295_s1 + $0x170] ss:$12 sps:$4 sm:$0xff]   ;;  %v1162_v40 = vld [vmem:[%s1296_s0 + $0x8] ss:$12 sps:$4 sm:$0xff]   ;;  %v986_v44 = vld [vmem:[%s1295_s1 + $0x158] ss:$12 sps:$4 sm:$0xff]  }
   0xf   :  { %541 = vmatpush1.bf16.msra.mxu0 %v925_v10  ;;  %v982_v42 = vld [vmem:[%s1295_s1 + $0xb0] ss:$12 sps:$4 sm:$0xff]   ;;  %v967_v45 = vld [vmem:[%s1295_s1 + $0x120] ss:$12 sps:$4 sm:$0xff]   ;;  %v987_v47 = vld [vmem:[%s1295_s1 + $0x98] ss:$12 sps:$4 sm:$0xff]  }
  0x10   :  { %542 = vmatprep.subr.bf16.mxu0 %v926_v13  ;;  %v994_v43 = vld [vmem:[%s1296_s0 + $0x4] ss:$12 sps:$4 sm:$0xff]   ;;  %v971_v46 = vld [vmem:[%s1295_s1 + $0x10c] ss:$12 sps:$4 sm:$0xff]   ;;  %v973_v49 = vld [vmem:[%s1295_s1 + $0x108] ss:$12 sps:$4 sm:$0xff]   ;;  %v725_v13 = vlaneseq }
  0x11   :  { %584 = vmatpush1.bf16.msra.mxu1 %v952_v21  ;;  %566 = vmatprep.mubr.bf16.mxu0 %v994_v43  ;;  %v991_v48 = vld [vmem:[%s1295_s1 + $0x140] ss:$12 sps:$4 sm:$0xff]   ;;  %v997_v52 = vld [vmem:[%s1295_s1 + $0x128] ss:$12 sps:$4 sm:$0xff]   ;;  %v979_v53 = vld [vmem:[%s1295_s1 + $0xf0] ss:$12 sps:$4 sm:$0xff]  }
  0x12   :  { %585 = vmatprep.subr.bf16.mxu1 %v956_v22  ;;  %v977_v50 = vld [vmem:[%s1295_s1 + $0xf4] ss:$12 sps:$4 sm:$0xff]   ;;  %v983_v54 = vld [vmem:[%s1295_s1 + $0xdc] ss:$12 sps:$4 sm:$0xff]   ;;  %v985_v57 = vld [vmem:[%s1295_s1 + $0xd8] ss:$12 sps:$4 sm:$0xff]  }
  0x13   :  { %543 = vmatpush1.bf16.msra.mxu0 %v928_v14  ;;  %v995_v51 = vld [vmem:[%s1295_s1 + $0x80] ss:$12 sps:$4 sm:$0xff]   ;;  %v998_v55 = vld [vmem:[%s1295_s1 + $0x68] ss:$12 sps:$4 sm:$0xff]   ;;  %v1000_v56 = vld [vmem:[%s1295_s1 + $0x110] ss:$12 sps:$4 sm:$0xff]  }
  0x14   :  { %544 = vmatprep.subr.bf16.mxu0 %v929_v16  ;;  %v988_v58 = vld [vmem:[%s1295_s1 + $0xc4] ss:$12 sps:$4 sm:$0xff]   ;;  %v990_v61 = vld [vmem:[%s1295_s1 + $0xc0] ss:$12 sps:$4 sm:$0xff]   ;;  %v1015_v3 = vmov 0.0   ;;  %v726_v14 = vshrl.u32 %v725_v13, 7 }
  0x15   :  { %586 = vmatpush1.bf16.msra.mxu1 %v958_v25  ;;  %v1001_v59 = vld [vmem:[%s1295_s1 + $0x50] ss:$12 sps:$4 sm:$0xff]   ;;  %v1003_v60 = vld [vmem:[%s1295_s1 + $0xf8] ss:$12 sps:$4 sm:$0xff]   ;;  %v1006_v63 = vld [vmem:[%s1295_s1 + $0xe0] ss:$12 sps:$4 sm:$0xff]  }
  0x16   :  { %587 = vmatprep.subr.bf16.mxu1 %v962_v26  ;;  %v1004_v62 = vld [vmem:[%s1295_s1 + $0x38] ss:$12 sps:$4 sm:$0xff]   ;;  %v992_v0 = vld [vmem:[%s1296_s0] ss:$12 sps:$4 sm:$0xff]   ;;  %v996_v1 = vld [vmem:[%s1295_s1 + $0x230] ss:$12 sps:$4 sm:$0xff]  }
  0x17   :  { %545 = vmatpush1.bf16.msra.mxu0 %v931_v19  ;;  %v1007_v2 = vld [vmem:[%s1295_s1 + $0x20] ss:$12 sps:$4 sm:$0xff]   ;;  %v1009_v4 = vld [vmem:[%s1295_s1 + $0xc8] ss:$12 sps:$4 sm:$0xff]   ;;  %v999_v5 = vld [vmem:[%s1295_s1 + $0x218] ss:$12 sps:$4 sm:$0xff]  }
  0x18   :  { %546 = vmatprep.subr.bf16.mxu0 %v935_v20  ;;  %v1010_v6 = vld [vmem:[%s1295_s1 + $0x8] ss:$12 sps:$4 sm:$0xff]   ;;  %v1002_v7 = vld [vmem:[%s1295_s1 + $0x200] ss:$12 sps:$4 sm:$0xff]   ;;  %v1008_v9 = vld [vmem:[%s1295_s1 + $0x1d0] ss:$12 sps:$4 sm:$0xff]  }
  0x19   :  { %588 = vmatpush1.bf16.msra.mxu1 %v964_v29  ;;  %v1005_v8 = vld [vmem:[%s1295_s1 + $0x1e8] ss:$12 sps:$4 sm:$0xff]   ;;  %v1011_v10 = vld [vmem:[%s1295_s1 + $0x1b8] ss:$12 sps:$4 sm:$0xff]   ;;  %v1012_v11 = vld [vmem:[%s1295_s1 + $0x1a0] ss:$12 sps:$4 sm:$0xff]  }
  0x1a   :  { %589 = vmatprep.subr.bf16.mxu1 %v968_v30  ;;  %v1013_v12 = vld [vmem:[%s1295_s1 + $0x188] ss:$12 sps:$4 sm:$0xff]   ;;  %v727_v16 = vsub.s32 0, %v726_v14  ;;  %v723_v18 = vld [vmem:[%s1297_s2] sm:$0x7]  ;;  %v731_v19 = vsub.s32 1, %v726_v14 }
  0x1b   :  { %547 = vmatpush1.bf16.msra.mxu0 %v937_v23  ;;  %v746_v21 = vld [vmem:[%s1298_s3] sm:$0x7] }
  0x1c   :  { %548 = vmatprep.subr.bf16.mxu0 %v941_v24  ;;  %v728_v23 = vrot.slane %v723_v18, %v727_v16  ;;  %v751_v26 = vrot.slane %v746_v21, %v727_v16 }
  0x1d   :  { %590 = vmatpush1.bf16.msra.mxu1 %v970_v33 }
  0x1e   :  { %591 = vmatprep.subr.bf16.mxu1 %v974_v34 }
  0x1f   :  { %549 = vmatpush1.bf16.msra.mxu0 %v943_v27 }
  0x20   :  { %550 = vmatprep.subr.bf16.mxu0 %v947_v28  ;;  %v732_v28 = vrot.slane %v723_v18, %v731_v19 }
  0x21   :  { %592 = vmatpush1.bf16.msra.mxu1 %v976_v36 }
  0x22   :  { %860 = vmatprep.subr.bf16.mxu1 %v980_v38 }
  0x23   :  { %551 = vmatpush2.bf16.msra.mxu0 %v949_v31  ;;  %v755_v31 = vrot.slane %v746_v21, %v731_v19 }
  0x24   :  { %552 = vmatprep.subr.bf16.mxu0 %v953_v32  ;;  %610 = vmatmul.mubr.bf16.vlgmr.msra.gmra.mxu1 %v1162_v40 }
  0x25   :  { %861 = vmatpush3.bf16.msra.mxu1 %v982_v42  ;;  %652 = vmatprep.mubr.bf16.mxu1 %v994_v43 }
  0x26   :  { %862 = vmatprep.subr.bf16.mxu1 %v986_v44 }
  0x27   :  { %553 = vmatpush2.bf16.msra.mxu0 %v955_v35 }
  0x28   :  { %554 = vmatprep.subr.bf16.mxu0 %v959_v37 }
  0x29   :  { %863 = vmatpush3.bf16.msra.mxu1 %v987_v47 }
  0x2a   :  { %864 = vmatprep.subr.bf16.mxu1 %v991_v48 }
  0x2b   :  { %555 = vmatpush2.bf16.msra.mxu0 %v961_v39 }
  0x2c   :  { %556 = vmatprep.subr.bf16.mxu0 %v965_v41 }
  0x2d   :  { %865 = vmatpush3.bf16.msra.mxu1 %v995_v51 }
  0x2e   :  { %866 = vmatprep.subr.bf16.mxu1 %v997_v52 }
  0x2f   :  { %557 = vmatpush2.bf16.msra.mxu0 %v967_v45 }
  0x30   :  { %558 = vmatprep.subr.bf16.mxu0 %v971_v46 }
  0x31   :  { %867 = vmatpush3.bf16.msra.mxu1 %v998_v55 }
  0x32   :  { %868 = vmatprep.subr.bf16.mxu1 %v1000_v56 }
  0x33   :  { %559 = vmatpush2.bf16.msra.mxu0 %v973_v49 }
  0x34   :  { %560 = vmatprep.subr.bf16.mxu0 %v977_v50  ;;  %v735_v50 = vsub.s32 2, %v726_v14 }
  0x35   :  { %869 = vmatpush3.bf16.msra.mxu1 %v1001_v59 }
  0x36   :  { %870 = vmatprep.subr.bf16.mxu1 %v1003_v60  ;;  %v736_v55 = vrot.slane %v723_v18, %v735_v50 }
  0x37   :  { %561 = vmatpush2.bf16.msra.mxu0 %v979_v53 }
  0x38   :  { %562 = vmatprep.subr.bf16.mxu0 %v983_v54 }
  0x39   :  { %871 = vmatpush3.bf16.msra.mxu1 %v1004_v62 }
  0x3a   :  { %872 = vmatprep.subr.bf16.mxu1 %v1006_v63 }
  0x3b   :  { %563 = vmatpush2.bf16.msra.mxu0 %v985_v57 }
  0x3c   :  { %564 = vmatprep.subr.bf16.mxu0 %v988_v58  ;;  %v759_v58 = vrot.slane %v746_v21, %v735_v50 }
  0x3d   :  { %873 = vmatpush3.bf16.msra.mxu1 %v1007_v2 }
  0x3e   :  { %874 = vmatprep.subr.bf16.mxu1 %v1009_v4 }
  0x3f   :  { %565 = vmatpush2.bf16.msra.mxu0 %v990_v61 }
  0x40   :  { %891 = vmatprep.subr.bf16.mxu0 %v1015_v3 }
  0x41   :  { %875 = vmatpush3.bf16.msra.mxu1 %v1010_v6 }
  0x42   :  { %567 = vmatmul.mubr.bf16.vlgmr.msra.gmra.mxu0 %v992_v0 }
  0x43   :  { %892 = vmatpush3.bf16.msra.mxu0 %v996_v1  ;;  %907 = vmatprep.mubr.msk.bf16.mxu0 %vm1016_vm0, %v1015_v3 }
  0x44   :  { %893 = vmatprep.subr.bf16.mxu0 %v1015_v3  ;;  %653 = vmatmul.mubr.bf16.vlgmr.msra.gmra.mxu1 %v992_v0 }
  0x47   :  { %894 = vmatpush3.bf16.msra.mxu0 %v999_v5 }
  0x48   :  { %895 = vmatprep.subr.bf16.mxu0 %v1015_v3 }
  0x4b   :  { %896 = vmatpush3.bf16.msra.mxu0 %v1002_v7 }
  0x4c   :  { %897 = vmatprep.subr.bf16.mxu0 %v1015_v3 }
  0x4f   :  { %898 = vmatpush3.bf16.msra.mxu0 %v1005_v8 }
  0x50   :  { %899 = vmatprep.subr.bf16.mxu0 %v1015_v3 }
  0x53   :  { %900 = vmatpush3.bf16.msra.mxu0 %v1008_v9 }
  0x54   :  { %901 = vmatprep.subr.bf16.mxu0 %v1015_v3 }
  0x57   :  { %902 = vmatpush3.bf16.msra.mxu0 %v1011_v10 }
  0x58   :  { %903 = vmatprep.subr.bf16.mxu0 %v1015_v3 }
  0x5b   :  { %904 = vmatpush3.bf16.msra.mxu0 %v1012_v11 }
  0x5c   :  { %905 = vmatprep.subr.bf16.mxu0 %v1015_v3 }
  0x5f   :  { %906 = vmatpush3.bf16.msra.mxu0 %v1013_v12 }
  0x62   :  { %908 = vmatmul.mubr.bf16.vlgmr.msra.gmra.mxu0 %v1162_v40 }
  0xe4   :  { %v611_v15 = vpop.f32.mrf.mxu1 }
  0xe6   :  { %v613_v17 = vpop.f32.mrf.mxu1 }
  0xe8   :  { %v615_v24 = vpop.f32.mrf.mxu1 }
  0xea   :  { %v617_v33 = vpop.f32.mrf.mxu1 }
 0x102   :  { %v568_v20 = vpop.f32.mrf.mxu0 }
 0x103   :  { %v612_v22 = vadd.f32 %v611_v15, %v568_v20 }
 0x104   :  { %v570_v25 = vpop.f32.mrf.mxu0  ;;  %v876_v47 = vpop.f32.mrf.mxu1 }
 0x105   :  { %v614_v27 = vadd.f32 %v613_v17, %v570_v25  ;;  %v740_v30 = vmul.f32 %v728_v23, %v612_v22 }
 0x106   :  { %v572_v29 = vpop.f32.mrf.mxu0  ;;  %v877_v48 = vpop.f32.mrf.mxu1 }
 0x107   :  { %v616_v32 = vadd.f32 %v615_v24, %v572_v29  ;;  %v763_v35 = vadd.f32 %v751_v26, %v740_v30  ;;  %v741_v36 = vmul.f32 %v732_v28, %v614_v27  ;;  %v878_v51 = vadd.f32 %v877_v48, %v876_v47 }
 0x108   :  { %v574_v34 = vpop.f32.mrf.mxu0  ;;  %v879_v49 = vpop.f32.mrf.mxu1 }
 0x109   :  { %v618_v37 = vadd.f32 %v617_v33, %v574_v34  ;;  %v769_v38 = vmax.f32 %v763_v35, 0.0  ;;  %v764_v39 = vadd.f32 %v755_v31, %v741_v36  ;;  %v743_v40 = vmul.f32 %v728_v23, %v616_v32 }
 0x10a   :  { %v880_v52 = vpop.f32.mrf.mxu1 }
 0x10b   :  { %775 = vst [vmem:[%s1299_s4] sm:$0xff] %v769_v38  ;;  %v770_v41 = vmax.f32 %v764_v39, 0.0  ;;  %v766_v42 = vadd.f32 %v751_v26, %v743_v40  ;;  %v744_v43 = vmul.f32 %v732_v28, %v618_v37  ;;  %v881_v57 = vadd.f32 %v880_v52, %v879_v49 }
 0x10d   :  { %776 = vst [vmem:[%s1299_s4 + $0x8] sm:$0xff] %v770_v41  ;;  %v772_v44 = vmax.f32 %v766_v42, 0.0  ;;  %v767_v45 = vadd.f32 %v755_v31, %v744_v43 }
 0x10f   :  { %778 = vst [vmem:[%s1299_s4 + $0x18] sm:$0xff] %v772_v44  ;;  %v773_v46 = vmax.f32 %v767_v45, 0.0 }
 0x111   :  { %779 = vst [vmem:[%s1299_s4 + $0x20] sm:$0xff] %v773_v46 }
 0x122   :  { %v695_v53 = vpop.f32.mrf.mxu0 }
 0x123   :  { %v696_v54 = vadd.f32 %v878_v51, %v695_v53 }
 0x124   :  { %v909_v56 = vpop.f32.mrf.mxu0 }
 0x125   :  { %v742_v60 = vmul.f32 %v736_v55, %v696_v54 }
 0x126   :  { %v698_v59 = vpop.f32.mrf.mxu0 }
 0x127   :  { %v699_v61 = vadd.f32 %v881_v57, %v698_v59  ;;  %v765_v63 = vadd.f32 %v759_v58, %v742_v60 }
 0x128   :  { %v910_v62 = vpop.f32.mrf.mxu0 }
 0x129   :  { %v771_v0 = vmax.f32 %v765_v63, 0.0  ;;  %v745_v1 = vmul.f32 %v736_v55, %v699_v61 }
 0x12b   :  { %777 = vst [vmem:[%s1299_s4 + $0x10] sm:$0xff] %v771_v0  ;;  %v768_v2 = vadd.f32 %v759_v58, %v745_v1 }
 0x12d   :  { %v774_v3 = vmax.f32 %v768_v2, 0.0 }
 0x12f   :  { %780 = vst [vmem:[%s1299_s4 + $0x28] sm:$0xff] %v774_v3 }

// kernel: generator_enc_forward.16
= control target key start
LH: loop header
LB: loop body
LE: loop exit
PB: predicated region body
PF: predicated region fallthrough
CT: control target
= control target key end

     0   :  { %s655_s1 = inlined_call_operand.vmem [shape: bf16[256,128], index: 1, kind: input, shape index: {}]   ;;  %s656_s0 = inlined_call_operand.vmem [shape: bf16[80,256], index: 0, kind: input, shape index: {}]   ;;  %s657_s2 = inlined_call_operand.vmem [shape: f32[1,128], index: 2, kind: input, shape index: {}]   ;;  %s658_s3 = inlined_call_operand.vmem [shape: f32[1,128], index: 3, kind: input, shape index: {}]   ;;  %s659_s4 = inlined_call_operand.vmem [shape: f32[80,128], index: 4, kind: output, shape index: {}]  }
   0x1   :  { %v485_v0 = vld [vmem:[%s655_s1 + $0x78] sm:$0xff]   ;;  %v487_v2 = vld [vmem:[%s655_s1 + $0x70] sm:$0xff]   ;;  %v489_v4 = vld [vmem:[%s655_s1 + $0x68] sm:$0xff]  }
   0x2   :  { %v486_v1 = vld [vmem:[%s655_s1 + $0x38] sm:$0xff]   ;;  %422 = vmatprep.subr.bf16.mxu0 %v485_v0  ;;  %468 = vmatprep.subr.bf16.mxu1 %v485_v0  ;;  %v488_v3 = vld [vmem:[%s655_s1 + $0x30] sm:$0xff]   ;;  %v490_v5 = vld [vmem:[%s655_s1 + $0x28] sm:$0xff]  }
   0x3   :  { %423 = vmatpush3.bf16.msra.mxu0 %v486_v1  ;;  %476 = vmatpush3.bf16.msra.mxu1 %v486_v1  ;;  %v491_v6 = vld [vmem:[%s655_s1 + $0x60] sm:$0xff]   ;;  %v493_v8 = vld [vmem:[%s655_s1 + $0x58] sm:$0xff]   ;;  %v495_v10 = vld [vmem:[%s655_s1 + $0x50] sm:$0xff]  }
   0x4   :  { %424 = vmatprep.subr.bf16.mxu0 %v487_v2  ;;  %469 = vmatprep.subr.bf16.mxu1 %v487_v2  ;;  %v492_v7 = vld [vmem:[%s655_s1 + $0x20] sm:$0xff]   ;;  %v494_v9 = vld [vmem:[%s655_s1 + $0x18] sm:$0xff]   ;;  %v496_v13 = vld [vmem:[%s655_s1 + $0x10] sm:$0xff]  }
   0x5   :  { %v503_v11 = vld [vmem:[%s656_s0 + $0x4] ss:$8 sps:$4 sm:$0xff]   ;;  %v506_v12 = vld [vmem:[%s656_s0 + $0x34] ss:$8 sps:$4 sm:$0xff]   ;;  %v501_v18 = vld [vmem:[%s656_s0] ss:$8 sps:$4 sm:$0xff]  }
   0x6   :  { %v497_v14 = vld [vmem:[%s655_s1 + $0x48] sm:$0xff]   ;;  %262 = vmatprep.mubr.bf16.mxu0 %v503_v11  ;;  %286 = vmatprep.mubr.bf16.mxu1 %v506_v12  ;;  %v499_v16 = vld [vmem:[%s655_s1 + $0x40] sm:$0xff]   ;;  %v504_v19 = vld [vmem:[%s656_s0 + $0x30] ss:$8 sps:$4 sm:$0xff]  }
   0x7   :  { %425 = vmatpush3.bf16.msra.mxu0 %v488_v3  ;;  %477 = vmatpush3.bf16.msra.mxu1 %v488_v3  ;;  %v498_v15 = vld [vmem:[%s655_s1 + $0x8] sm:$0xff]   ;;  %v500_v17 = vld [vmem:[%s655_s1] sm:$0xff]   ;;  %v507_v20 = vld [vmem:[%s656_s0 + $0x14] ss:$8 sps:$4 sm:$0xff]  }
   0x8   :  { %426 = vmatprep.subr.bf16.mxu0 %v489_v4  ;;  %470 = vmatprep.subr.bf16.mxu1 %v489_v4  ;;  %v510_v21 = vld [vmem:[%s656_s0 + $0x44] ss:$8 sps:$4 sm:$0xff]   ;;  %v509_v22 = vld [vmem:[%s656_s0 + $0x10] ss:$8 sps:$4 sm:$0xff]   ;;  %v512_v23 = vld [vmem:[%s656_s0 + $0x40] ss:$8 sps:$4 sm:$0xff]  }
   0x9   :  { %v513_v24 = vld [vmem:[%s656_s0 + $0x24] ss:$8 sps:$4 sm:$0xff]   ;;  %v515_v25 = vld [vmem:[%s656_s0 + $0x20] ss:$8 sps:$4 sm:$0xff]  }
   0xa   :  { %v420_v32 = vld [vmem:[%s657_s2] ss:$0 sm:$0xff] }
   0xb   :  { %427 = vmatpush3.bf16.msra.mxu0 %v490_v5  ;;  %478 = vmatpush3.bf16.msra.mxu1 %v490_v5  ;;  %v421_v35 = vld [vmem:[%s658_s3] ss:$0 sm:$0xff] }
   0xc   :  { %428 = vmatprep.subr.bf16.mxu0 %v491_v6  ;;  %471 = vmatprep.subr.bf16.mxu1 %v491_v6 }
   0xf   :  { %429 = vmatpush3.bf16.msra.mxu0 %v492_v7  ;;  %479 = vmatpush3.bf16.msra.mxu1 %v492_v7 }
  0x10   :  { %430 = vmatprep.subr.bf16.mxu0 %v493_v8  ;;  %472 = vmatprep.subr.bf16.mxu1 %v493_v8 }
  0x13   :  { %431 = vmatpush3.bf16.msra.mxu0 %v494_v9  ;;  %480 = vmatpush3.bf16.msra.mxu1 %v494_v9 }
  0x14   :  { %432 = vmatprep.subr.bf16.mxu0 %v495_v10  ;;  %473 = vmatprep.subr.bf16.mxu1 %v495_v10 }
  0x17   :  { %433 = vmatpush3.bf16.msra.mxu0 %v496_v13  ;;  %481 = vmatpush3.bf16.msra.mxu1 %v496_v13 }
  0x18   :  { %434 = vmatprep.subr.bf16.mxu0 %v497_v14  ;;  %474 = vmatprep.subr.bf16.mxu1 %v497_v14 }
  0x1b   :  { %435 = vmatpush3.bf16.msra.mxu0 %v498_v15  ;;  %482 = vmatpush3.bf16.msra.mxu1 %v498_v15 }
  0x1c   :  { %436 = vmatprep.subr.bf16.mxu0 %v499_v16  ;;  %475 = vmatprep.subr.bf16.mxu1 %v499_v16 }
  0x1f   :  { %437 = vmatpush3.bf16.msra.mxu0 %v500_v17  ;;  %483 = vmatpush3.bf16.msra.mxu1 %v500_v17 }
  0x22   :  { %263 = vmatmul.mubr.bf16.vlgmr.msra.gmra.mxu0 %v501_v18  ;;  %287 = vmatmul.mubr.bf16.vlgmr.msra.gmra.mxu1 %v504_v19 }
  0x23   :  { %270 = vmatprep.mubr.bf16.mxu0 %v507_v20  ;;  %294 = vmatprep.mubr.bf16.mxu1 %v510_v21 }
  0x2a   :  { %271 = vmatmul.mubr.bf16.gmra.mxu0 %v509_v22  ;;  %295 = vmatmul.mubr.bf16.gmra.mxu1 %v512_v23 }
  0x2b   :  { %278 = vmatprep.mubr.bf16.mxu0 %v513_v24 }
  0x32   :  { %279 = vmatmul.mubr.bf16.gmra.mxu0 %v515_v25 }
  0xe2   :  { %v438_v26 = vpop.f32.mrf.mxu0  ;;  %v456_v27 = vpop.f32.mrf.mxu1 }
  0xe4   :  { %v439_v28 = vpop.f32.mrf.mxu0  ;;  %v457_v29 = vpop.f32.mrf.mxu1 }
  0xe5   :  { %v440_v30 = vadd.f32 %v439_v28, %v438_v26  ;;  %v458_v31 = vadd.f32 %v457_v29, %v456_v27 }
  0xe6   :  { %v441_v33 = vpop.f32.mrf.mxu0  ;;  %v459_v34 = vpop.f32.mrf.mxu1 }
  0xe7   :  { %v343_v38 = vmul.f32 %v440_v30, %v420_v32  ;;  %v349_v39 = vmul.f32 %v458_v31, %v420_v32 }
  0xe8   :  { %v442_v36 = vpop.f32.mrf.mxu0  ;;  %v460_v37 = vpop.f32.mrf.mxu1 }
  0xe9   :  { %v443_v40 = vadd.f32 %v442_v36, %v441_v33  ;;  %v461_v41 = vadd.f32 %v460_v37, %v459_v34  ;;  %v360_v44 = vadd.f32 %v421_v35, %v343_v38  ;;  %v366_v45 = vadd.f32 %v421_v35, %v349_v39 }
  0xea   :  { %v444_v42 = vpop.f32.mrf.mxu0  ;;  %v462_v43 = vpop.f32.mrf.mxu1 }
  0xeb   :  { %v370_v48 = vmax.f32 %v360_v44, 0.0  ;;  %v376_v49 = vmax.f32 %v366_v45, 0.0  ;;  %v344_v50 = vmul.f32 %v443_v40, %v420_v32  ;;  %v350_v51 = vmul.f32 %v461_v41, %v420_v32 }
  0xec   :  { %v445_v46 = vpop.f32.mrf.mxu0  ;;  %v463_v47 = vpop.f32.mrf.mxu1 }
  0xed   :  { %v446_v52 = vadd.f32 %v445_v46, %v444_v42  ;;  %v464_v54 = vadd.f32 %v463_v47, %v462_v43  ;;  %380 = vst [vmem:[%s659_s4] sm:$0xff] %v370_v48  ;;  %386 = vst [vmem:[%s659_s4 + $0x30] sm:$0xff] %v376_v49  ;;  %v361_v56 = vadd.f32 %v421_v35, %v344_v50 }
  0xee   :  { %v447_v53 = vpop.f32.mrf.mxu0  ;;  %v465_v55 = vpop.f32.mrf.mxu1  ;;  %v367_v57 = vadd.f32 %v421_v35, %v350_v51 }
  0xef   :  { %v371_v60 = vmax.f32 %v361_v56, 0.0  ;;  %v345_v0 = vmul.f32 %v446_v52, %v420_v32  ;;  %v351_v1 = vmul.f32 %v464_v54, %v420_v32 }
  0xf0   :  { %v448_v58 = vpop.f32.mrf.mxu0  ;;  %v466_v59 = vpop.f32.mrf.mxu1  ;;  %v377_v61 = vmax.f32 %v367_v57, 0.0 }
  0xf1   :  { %v449_v62 = vadd.f32 %v448_v58, %v447_v53  ;;  %v467_v63 = vadd.f32 %v466_v59, %v465_v55  ;;  %381 = vst [vmem:[%s659_s4 + $0x8] sm:$0xff] %v371_v60  ;;  %v362_v3 = vadd.f32 %v421_v35, %v345_v0  ;;  %v368_v4 = vadd.f32 %v421_v35, %v351_v1 }
  0xf2   :  { %v450_v2 = vpop.f32.mrf.mxu0  ;;  %387 = vst [vmem:[%s659_s4 + $0x38] sm:$0xff] %v377_v61 }
  0xf3   :  { %v346_v6 = vmul.f32 %v449_v62, %v420_v32  ;;  %v352_v7 = vmul.f32 %v467_v63, %v420_v32  ;;  %v372_v9 = vmax.f32 %v362_v3, 0.0  ;;  %v378_v10 = vmax.f32 %v368_v4, 0.0 }
  0xf4   :  { %v451_v5 = vpop.f32.mrf.mxu0 }
  0xf5   :  { %v452_v8 = vadd.f32 %v451_v5, %v450_v2  ;;  %v363_v12 = vadd.f32 %v421_v35, %v346_v6  ;;  %v369_v13 = vadd.f32 %v421_v35, %v352_v7  ;;  %382 = vst [vmem:[%s659_s4 + $0x10] sm:$0xff] %v372_v9  ;;  %388 = vst [vmem:[%s659_s4 + $0x40] sm:$0xff] %v378_v10 }
  0xf6   :  { %v453_v11 = vpop.f32.mrf.mxu0 }
  0xf7   :  { %v373_v15 = vmax.f32 %v363_v12, 0.0  ;;  %v379_v16 = vmax.f32 %v369_v13, 0.0  ;;  %v347_v17 = vmul.f32 %v452_v8, %v420_v32 }
  0xf8   :  { %v454_v14 = vpop.f32.mrf.mxu0 }
  0xf9   :  { %v455_v18 = vadd.f32 %v454_v14, %v453_v11  ;;  %383 = vst [vmem:[%s659_s4 + $0x18] sm:$0xff] %v373_v15  ;;  %389 = vst [vmem:[%s659_s4 + $0x48] sm:$0xff] %v379_v16  ;;  %v364_v19 = vadd.f32 %v421_v35, %v347_v17 }
  0xfb   :  { %v374_v20 = vmax.f32 %v364_v19, 0.0  ;;  %v348_v21 = vmul.f32 %v455_v18, %v420_v32 }
  0xfd   :  { %384 = vst [vmem:[%s659_s4 + $0x20] sm:$0xff] %v374_v20  ;;  %v365_v22 = vadd.f32 %v421_v35, %v348_v21 }
  0xff   :  { %v375_v23 = vmax.f32 %v365_v22, 0.0 }
 0x101   :  { %385 = vst [vmem:[%s659_s4 + $0x28] sm:$0xff] %v375_v23 }

// kernel: generator_enc_forward.17
= control target key start
LH: loop header
LB: loop body
LE: loop exit
PB: predicated region body
PF: predicated region fallthrough
CT: control target
= control target key end

     0   :  { %s1266_s1 = inlined_call_operand.vmem [shape: bf16[128,128], index: 1, kind: input, shape index: {}]   ;;  %s1267_s0 = inlined_call_operand.vmem [shape: bf16[288,128], index: 0, kind: input, shape index: {}]   ;;  %s1268_s2 = inlined_call_operand.vmem [shape: f32[1,128], index: 2, kind: input, shape index: {}]   ;;  %s1269_s3 = inlined_call_operand.vmem [shape: f32[1,128], index: 3, kind: input, shape index: {}]   ;;  %s1270_s4 = inlined_call_operand.vmem [shape: f32[288,128], index: 4, kind: output, shape index: {}]  }
   0x1   :  { %v875_v0 = vld [vmem:[%s1266_s1 + $0x38] sm:$0xff]   ;;  %v876_v1 = vld [vmem:[%s1266_s1 + $0x30] sm:$0xff]   ;;  %v877_v2 = vld [vmem:[%s1266_s1 + $0x28] sm:$0xff]  }
   0x2   :  { %806 = vmatprep.subr.bf16.mxu0 %v875_v0  ;;  %858 = vmatprep.subr.bf16.mxu1 %v875_v0  ;;  %v878_v3 = vld [vmem:[%s1266_s1 + $0x20] sm:$0xff]   ;;  %v885_v5 = vld [vmem:[%s1267_s0 + $0x50] sm:$0xff]   ;;  %v879_v6 = vld [vmem:[%s1266_s1 + $0x18] sm:$0xff]  }
   0x3   :  { %807 = vmatpush3.bf16.msra.mxu0 %v875_v0  ;;  %866 = vmatpush3.bf16.msra.mxu1 %v875_v0  ;;  %v883_v4 = vld [vmem:[%s1267_s0] sm:$0xff]   ;;  %v880_v7 = vld [vmem:[%s1266_s1 + $0x10] sm:$0xff]   ;;  %v881_v8 = vld [vmem:[%s1266_s1 + $0x8] sm:$0xff]  }
   0x4   :  { %808 = vmatprep.subr.bf16.mxu0 %v876_v1  ;;  %859 = vmatprep.subr.bf16.mxu1 %v876_v1  ;;  %v882_v9 = vld [vmem:[%s1266_s1] sm:$0xff]   ;;  %v884_v10 = vld [vmem:[%s1267_s0 + $0x8] sm:$0xff]   ;;  %v886_v11 = vld [vmem:[%s1267_s0 + $0x58] sm:$0xff]  }
   0x5   :  { %822 = vmatprep.mubr.bf16.mxu0 %v883_v4  ;;  %842 = vmatprep.mubr.bf16.mxu1 %v885_v5  ;;  %v887_v12 = vld [vmem:[%s1267_s0 + $0x10] sm:$0xff]   ;;  %v889_v13 = vld [vmem:[%s1267_s0 + $0x60] sm:$0xff]   ;;  %v888_v14 = vld [vmem:[%s1267_s0 + $0x18] sm:$0xff]  }
   0x6   :  { %v890_v15 = vld [vmem:[%s1267_s0 + $0x68] sm:$0xff]   ;;  %v891_v16 = vld [vmem:[%s1267_s0 + $0x20] sm:$0xff]   ;;  %v893_v17 = vld [vmem:[%s1267_s0 + $0x70] sm:$0xff]  }
   0x7   :  { %809 = vmatpush3.bf16.msra.mxu0 %v876_v1  ;;  %867 = vmatpush3.bf16.msra.mxu1 %v876_v1  ;;  %v892_v18 = vld [vmem:[%s1267_s0 + $0x28] sm:$0xff]   ;;  %v894_v19 = vld [vmem:[%s1267_s0 + $0x78] sm:$0xff]   ;;  %v895_v20 = vld [vmem:[%s1267_s0 + $0x30] sm:$0xff]  }
   0x8   :  { %810 = vmatprep.subr.bf16.mxu0 %v877_v2  ;;  %860 = vmatprep.subr.bf16.mxu1 %v877_v2  ;;  %v897_v21 = vld [vmem:[%s1267_s0 + $0x80] sm:$0xff]   ;;  %v896_v22 = vld [vmem:[%s1267_s0 + $0x38] sm:$0xff]   ;;  %v898_v23 = vld [vmem:[%s1267_s0 + $0x88] sm:$0xff]  }
   0x9   :  { %v899_v24 = vld [vmem:[%s1267_s0 + $0x40] sm:$0xff]   ;;  %v900_v25 = vld [vmem:[%s1267_s0 + $0x48] sm:$0xff]  }
   0xa   :  { %v1079_v27 = vld [vmem:[%s1268_s2] ss:$0 sm:$0xff] }
   0xb   :  { %811 = vmatpush3.bf16.msra.mxu0 %v877_v2  ;;  %868 = vmatpush3.bf16.msra.mxu1 %v877_v2  ;;  %v1084_v29 = vld [vmem:[%s1269_s3] ss:$0 sm:$0xff] }
   0xc   :  { %812 = vmatprep.subr.bf16.mxu0 %v878_v3  ;;  %861 = vmatprep.subr.bf16.mxu1 %v878_v3 }
   0xf   :  { %813 = vmatpush3.bf16.msra.mxu0 %v878_v3  ;;  %869 = vmatpush3.bf16.msra.mxu1 %v878_v3 }
  0x10   :  { %814 = vmatprep.subr.bf16.mxu0 %v879_v6  ;;  %862 = vmatprep.subr.bf16.mxu1 %v879_v6 }
  0x13   :  { %815 = vmatpush3.bf16.msra.mxu0 %v879_v6  ;;  %870 = vmatpush3.bf16.msra.mxu1 %v879_v6 }
  0x14   :  { %816 = vmatprep.subr.bf16.mxu0 %v880_v7  ;;  %863 = vmatprep.subr.bf16.mxu1 %v880_v7 }
  0x17   :  { %817 = vmatpush3.bf16.msra.mxu0 %v880_v7  ;;  %871 = vmatpush3.bf16.msra.mxu1 %v880_v7 }
  0x18   :  { %818 = vmatprep.subr.bf16.mxu0 %v881_v8  ;;  %864 = vmatprep.subr.bf16.mxu1 %v881_v8 }
  0x1b   :  { %819 = vmatpush3.bf16.msra.mxu0 %v881_v8  ;;  %872 = vmatpush3.bf16.msra.mxu1 %v881_v8 }
  0x1c   :  { %820 = vmatprep.subr.bf16.mxu0 %v882_v9  ;;  %865 = vmatprep.subr.bf16.mxu1 %v882_v9 }
  0x1f   :  { %821 = vmatpush3.bf16.msra.mxu0 %v882_v9  ;;  %873 = vmatpush3.bf16.msra.mxu1 %v882_v9 }
  0x22   :  { %823 = vmatmul.mubr.bf16.vlgmr.msra.gmra.mxu0 %v884_v10  ;;  %843 = vmatmul.mubr.bf16.vlgmr.msra.gmra.mxu1 %v886_v11 }
  0x23   :  { %826 = vmatprep.mubr.bf16.mxu0 %v887_v12  ;;  %846 = vmatprep.mubr.bf16.mxu1 %v889_v13 }
  0x2a   :  { %827 = vmatmul.mubr.bf16.gmra.mxu0 %v888_v14  ;;  %847 = vmatmul.mubr.bf16.gmra.mxu1 %v890_v15 }
  0x2b   :  { %830 = vmatprep.mubr.bf16.mxu0 %v891_v16  ;;  %850 = vmatprep.mubr.bf16.mxu1 %v893_v17 }
  0x32   :  { %831 = vmatmul.mubr.bf16.gmra.mxu0 %v892_v18  ;;  %851 = vmatmul.mubr.bf16.gmra.mxu1 %v894_v19 }
  0x33   :  { %834 = vmatprep.mubr.bf16.mxu0 %v895_v20  ;;  %854 = vmatprep.mubr.bf16.mxu1 %v897_v21 }
  0x3a   :  { %835 = vmatmul.mubr.bf16.gmra.mxu0 %v896_v22  ;;  %855 = vmatmul.mubr.bf16.gmra.mxu1 %v898_v23 }
  0x3b   :  { %838 = vmatprep.mubr.bf16.mxu0 %v899_v24 }
  0x42   :  { %839 = vmatmul.mubr.bf16.gmra.mxu0 %v900_v25 }
  0xe2   :  { %v824_v26 = vpop.f32.mrf.mxu0  ;;  %v844_v28 = vpop.f32.mrf.mxu1 }
  0xe3   :  { %v599_v32 = vmul.f32 %v824_v26, %v1079_v27  ;;  %v619_v33 = vmul.f32 %v844_v28, %v1079_v27 }
  0xe4   :  { %v336_v30 = vpop.f32.mrf.mxu0  ;;  %v416_v31 = vpop.f32.mrf.mxu1 }
  0xe5   :  { %v642_v36 = vadd.f32 %v1084_v29, %v599_v32  ;;  %v597_v37 = vmul.f32 %v1079_v27, %v336_v30  ;;  %v662_v38 = vadd.f32 %v1084_v29, %v619_v33  ;;  %v617_v39 = vmul.f32 %v1079_v27, %v416_v31 }
  0xe6   :  { %v825_v34 = vpop.f32.mrf.mxu0  ;;  %v845_v35 = vpop.f32.mrf.mxu1 }
  0xe7   :  { %901 = vtanh.f32 %v642_v36  ;;  %v640_v42 = vadd.f32 %v1084_v29, %v597_v37  ;;  %v600_v43 = vmul.f32 %v825_v34, %v1079_v27  ;;  %v660_v44 = vadd.f32 %v1084_v29, %v617_v39 }
  0xe8   :  { %v339_v40 = vpop.f32.mrf.mxu0  ;;  %v419_v41 = vpop.f32.mrf.mxu1  ;;  %903 = vtanh.f32 %v662_v38  ;;  %v620_v45 = vmul.f32 %v845_v35, %v1079_v27 }
  0xe9   :  { %905 = vtanh.f32 %v640_v42  ;;  %v643_v48 = vadd.f32 %v1084_v29, %v600_v43  ;;  %v598_v49 = vmul.f32 %v1079_v27, %v339_v40  ;;  %v618_v51 = vmul.f32 %v1079_v27, %v419_v41 }
  0xea   :  { %v828_v46 = vpop.f32.mrf.mxu0  ;;  %v848_v47 = vpop.f32.mrf.mxu1  ;;  %907 = vtanh.f32 %v660_v44  ;;  %v663_v50 = vadd.f32 %v1084_v29, %v620_v45 }
  0xeb   :  { %909 = vtanh.f32 %v643_v48  ;;  %v641_v54 = vadd.f32 %v1084_v29, %v598_v49  ;;  %v603_v55 = vmul.f32 %v828_v46, %v1079_v27  ;;  %v661_v56 = vadd.f32 %v1084_v29, %v618_v51 }
  0xec   :  { %v352_v52 = vpop.f32.mrf.mxu0  ;;  %v432_v53 = vpop.f32.mrf.mxu1  ;;  %911 = vtanh.f32 %v663_v50  ;;  %v623_v57 = vmul.f32 %v848_v47, %v1079_v27 }
  0xed   :  { %913 = vtanh.f32 %v641_v54  ;;  %v646_v60 = vadd.f32 %v1084_v29, %v603_v55  ;;  %v601_v61 = vmul.f32 %v1079_v27, %v352_v52  ;;  %v621_v63 = vmul.f32 %v1079_v27, %v432_v53 }
  0xee   :  { %v829_v58 = vpop.f32.mrf.mxu0  ;;  %v849_v59 = vpop.f32.mrf.mxu1  ;;  %915 = vtanh.f32 %v661_v56  ;;  %v666_v62 = vadd.f32 %v1084_v29, %v623_v57 }
  0xef   :  { %917 = vtanh.f32 %v646_v60  ;;  %v644_v2 = vadd.f32 %v1084_v29, %v601_v61  ;;  %v604_v3 = vmul.f32 %v829_v58, %v1079_v27  ;;  %v664_v4 = vadd.f32 %v1084_v29, %v621_v63 }
  0xf0   :  { %v355_v0 = vpop.f32.mrf.mxu0  ;;  %v435_v1 = vpop.f32.mrf.mxu1  ;;  %919 = vtanh.f32 %v666_v62  ;;  %v624_v5 = vmul.f32 %v849_v59, %v1079_v27 }
  0xf1   :  { %921 = vtanh.f32 %v644_v2  ;;  %v647_v8 = vadd.f32 %v1084_v29, %v604_v3  ;;  %v602_v9 = vmul.f32 %v1079_v27, %v355_v0  ;;  %v622_v11 = vmul.f32 %v1079_v27, %v435_v1 }
  0xf2   :  { %v832_v6 = vpop.f32.mrf.mxu0  ;;  %v852_v7 = vpop.f32.mrf.mxu1  ;;  %923 = vtanh.f32 %v664_v4  ;;  %v667_v10 = vadd.f32 %v1084_v29, %v624_v5 }
  0xf3   :  { %925 = vtanh.f32 %v647_v8  ;;  %v645_v14 = vadd.f32 %v1084_v29, %v602_v9  ;;  %v607_v15 = vmul.f32 %v832_v6, %v1079_v27  ;;  %v665_v17 = vadd.f32 %v1084_v29, %v622_v11 }
  0xf4   :  { %v368_v12 = vpop.f32.mrf.mxu0  ;;  %v448_v13 = vpop.f32.mrf.mxu1  ;;  %927 = vtanh.f32 %v667_v10  ;;  %v627_v18 = vmul.f32 %v852_v7, %v1079_v27 }
  0xf5   :  { %v902_v16 = vpop.eup %901  ;;  %929 = vtanh.f32 %v645_v14  ;;  %v650_v22 = vadd.f32 %v1084_v29, %v607_v15  ;;  %v605_v23 = vmul.f32 %v1079_v27, %v368_v12  ;;  %v625_v26 = vmul.f32 %v1079_v27, %v448_v13 }
  0xf6   :  { %v833_v19 = vpop.f32.mrf.mxu0  ;;  %v853_v20 = vpop.f32.mrf.mxu1  ;;  %714 = vst [vmem:[%s1270_s4 + $0x10] sm:$0xff] %v902_v16  ;;  %931 = vtanh.f32 %v665_v17  ;;  %v670_v25 = vadd.f32 %v1084_v29, %v627_v18 }
  0xf7   :  { %v904_v21 = vpop.eup %903  ;;  %933 = vtanh.f32 %v650_v22  ;;  %v648_v32 = vadd.f32 %v1084_v29, %v605_v23  ;;  %v608_v33 = vmul.f32 %v833_v19, %v1079_v27  ;;  %v668_v35 = vadd.f32 %v1084_v29, %v625_v26 }
  0xf8   :  { %v906_v24 = vpop.eup %905  ;;  %734 = vst [vmem:[%s1270_s4 + $0xb0] sm:$0xff] %v904_v21  ;;  %v371_v28 = vpop.f32.mrf.mxu0  ;;  %935 = vtanh.f32 %v670_v25  ;;  %v628_v36 = vmul.f32 %v853_v20, %v1079_v27 }
  0xf9   :  { %v451_v30 = vpop.f32.mrf.mxu1  ;;  %v908_v31 = vpop.eup %907  ;;  %712 = vst [vmem:[%s1270_s4] sm:$0xff] %v906_v24  ;;  %937 = vtanh.f32 %v648_v32  ;;  %v651_v40 = vadd.f32 %v1084_v29, %v608_v33  ;;  %v606_v41 = vmul.f32 %v1079_v27, %v371_v28 }
  0xfa   :  { %v910_v34 = vpop.eup %909  ;;  %732 = vst [vmem:[%s1270_s4 + $0xa0] sm:$0xff] %v908_v31  ;;  %v836_v37 = vpop.f32.mrf.mxu0  ;;  %939 = vtanh.f32 %v668_v35  ;;  %v671_v43 = vadd.f32 %v1084_v29, %v628_v36  ;;  %v626_v44 = vmul.f32 %v1079_v27, %v451_v30 }
  0xfb   :  { %v856_v38 = vpop.f32.mrf.mxu1  ;;  %v912_v39 = vpop.eup %911  ;;  %715 = vst [vmem:[%s1270_s4 + $0x18] sm:$0xff] %v910_v34  ;;  %941 = vtanh.f32 %v651_v40  ;;  %v649_v48 = vadd.f32 %v1084_v29, %v606_v41  ;;  %v611_v49 = vmul.f32 %v836_v37, %v1079_v27 }
  0xfc   :  { %v914_v42 = vpop.eup %913  ;;  %735 = vst [vmem:[%s1270_s4 + $0xb8] sm:$0xff] %v912_v39  ;;  %v384_v45 = vpop.f32.mrf.mxu0  ;;  %943 = vtanh.f32 %v671_v43  ;;  %v669_v51 = vadd.f32 %v1084_v29, %v626_v44  ;;  %v631_v52 = vmul.f32 %v856_v38, %v1079_v27 }
  0xfd   :  { %v464_v46 = vpop.f32.mrf.mxu1  ;;  %v916_v47 = vpop.eup %915  ;;  %713 = vst [vmem:[%s1270_s4 + $0x8] sm:$0xff] %v914_v42  ;;  %945 = vtanh.f32 %v649_v48  ;;  %v654_v56 = vadd.f32 %v1084_v29, %v611_v49  ;;  %v609_v57 = vmul.f32 %v1079_v27, %v384_v45 }
  0xfe   :  { %v918_v50 = vpop.eup %917  ;;  %733 = vst [vmem:[%s1270_s4 + $0xa8] sm:$0xff] %v916_v47  ;;  %v837_v53 = vpop.f32.mrf.mxu0  ;;  %947 = vtanh.f32 %v669_v51  ;;  %v674_v59 = vadd.f32 %v1084_v29, %v631_v52  ;;  %v629_v60 = vmul.f32 %v1079_v27, %v464_v46 }
  0xff   :  { %v857_v54 = vpop.f32.mrf.mxu1  ;;  %v920_v55 = vpop.eup %919  ;;  %718 = vst [vmem:[%s1270_s4 + $0x30] sm:$0xff] %v918_v50  ;;  %949 = vtanh.f32 %v654_v56  ;;  %v652_v0 = vadd.f32 %v1084_v29, %v609_v57  ;;  %v612_v1 = vmul.f32 %v837_v53, %v1079_v27 }
 0x100   :  { %v922_v58 = vpop.eup %921  ;;  %738 = vst [vmem:[%s1270_s4 + $0xd0] sm:$0xff] %v920_v55  ;;  %v387_v61 = vpop.f32.mrf.mxu0  ;;  %951 = vtanh.f32 %v674_v59  ;;  %v672_v3 = vadd.f32 %v1084_v29, %v629_v60  ;;  %v632_v4 = vmul.f32 %v857_v54, %v1079_v27 }
 0x101   :  { %v467_v62 = vpop.f32.mrf.mxu1  ;;  %v924_v63 = vpop.eup %923  ;;  %716 = vst [vmem:[%s1270_s4 + $0x20] sm:$0xff] %v922_v58  ;;  %953 = vtanh.f32 %v652_v0  ;;  %v655_v7 = vadd.f32 %v1084_v29, %v612_v1  ;;  %v610_v8 = vmul.f32 %v1079_v27, %v387_v61 }
 0x102   :  { %v926_v2 = vpop.eup %925  ;;  %736 = vst [vmem:[%s1270_s4 + $0xc0] sm:$0xff] %v924_v63  ;;  %v840_v5 = vpop.f32.mrf.mxu0  ;;  %955 = vtanh.f32 %v672_v3  ;;  %v675_v10 = vadd.f32 %v1084_v29, %v632_v4  ;;  %v630_v11 = vmul.f32 %v1079_v27, %v467_v62 }
 0x103   :  { %v928_v6 = vpop.eup %927  ;;  %719 = vst [vmem:[%s1270_s4 + $0x38] sm:$0xff] %v926_v2  ;;  %957 = vtanh.f32 %v655_v7  ;;  %v653_v14 = vadd.f32 %v1084_v29, %v610_v8  ;;  %v615_v15 = vmul.f32 %v840_v5, %v1079_v27 }
 0x104   :  { %v930_v9 = vpop.eup %929  ;;  %739 = vst [vmem:[%s1270_s4 + $0xd8] sm:$0xff] %v928_v6  ;;  %v400_v12 = vpop.f32.mrf.mxu0  ;;  %959 = vtanh.f32 %v675_v10  ;;  %v673_v17 = vadd.f32 %v1084_v29, %v630_v11 }
 0x105   :  { %v932_v13 = vpop.eup %931  ;;  %717 = vst [vmem:[%s1270_s4 + $0x28] sm:$0xff] %v930_v9  ;;  %961 = vtanh.f32 %v653_v14  ;;  %v658_v20 = vadd.f32 %v1084_v29, %v615_v15  ;;  %v613_v21 = vmul.f32 %v1079_v27, %v400_v12 }
 0x106   :  { %v934_v16 = vpop.eup %933  ;;  %737 = vst [vmem:[%s1270_s4 + $0xc8] sm:$0xff] %v932_v13  ;;  %v841_v18 = vpop.f32.mrf.mxu0  ;;  %963 = vtanh.f32 %v673_v17 }
 0x107   :  { %v936_v19 = vpop.eup %935  ;;  %722 = vst [vmem:[%s1270_s4 + $0x50] sm:$0xff] %v934_v16  ;;  %965 = vtanh.f32 %v658_v20  ;;  %v656_v25 = vadd.f32 %v1084_v29, %v613_v21  ;;  %v616_v26 = vmul.f32 %v841_v18, %v1079_v27 }
 0x108   :  { %v938_v22 = vpop.eup %937  ;;  %742 = vst [vmem:[%s1270_s4 + $0xf0] sm:$0xff] %v936_v19  ;;  %v403_v23 = vpop.f32.mrf.mxu0 }
 0x109   :  { %v940_v24 = vpop.eup %939  ;;  %720 = vst [vmem:[%s1270_s4 + $0x40] sm:$0xff] %v938_v22  ;;  %967 = vtanh.f32 %v656_v25  ;;  %v659_v31 = vadd.f32 %v1084_v29, %v616_v26  ;;  %v614_v32 = vmul.f32 %v1079_v27, %v403_v23 }
 0x10a   :  { %v942_v28 = vpop.eup %941  ;;  %740 = vst [vmem:[%s1270_s4 + $0xe0] sm:$0xff] %v940_v24 }
 0x10b   :  { %v944_v30 = vpop.eup %943  ;;  %723 = vst [vmem:[%s1270_s4 + $0x58] sm:$0xff] %v942_v28  ;;  %969 = vtanh.f32 %v659_v31  ;;  %v657_v35 = vadd.f32 %v1084_v29, %v614_v32 }
 0x10c   :  { %v946_v33 = vpop.eup %945  ;;  %743 = vst [vmem:[%s1270_s4 + $0xf8] sm:$0xff] %v944_v30 }
 0x10d   :  { %v948_v34 = vpop.eup %947  ;;  %721 = vst [vmem:[%s1270_s4 + $0x48] sm:$0xff] %v946_v33  ;;  %971 = vtanh.f32 %v657_v35 }
 0x10e   :  { %v950_v36 = vpop.eup %949  ;;  %741 = vst [vmem:[%s1270_s4 + $0xe8] sm:$0xff] %v948_v34 }
 0x10f   :  { %v952_v37 = vpop.eup %951  ;;  %726 = vst [vmem:[%s1270_s4 + $0x70] sm:$0xff] %v950_v36 }
 0x110   :  { %v954_v27 = vpop.eup %953  ;;  %746 = vst [vmem:[%s1270_s4 + $0x110] sm:$0xff] %v952_v37 }
 0x111   :  { %v956_v38 = vpop.eup %955  ;;  %724 = vst [vmem:[%s1270_s4 + $0x60] sm:$0xff] %v954_v27 }
 0x112   :  { %v958_v29 = vpop.eup %957  ;;  %744 = vst [vmem:[%s1270_s4 + $0x100] sm:$0xff] %v956_v38 }
 0x113   :  { %v960_v39 = vpop.eup %959  ;;  %727 = vst [vmem:[%s1270_s4 + $0x78] sm:$0xff] %v958_v29 }
 0x114   :  { %v962_v40 = vpop.eup %961  ;;  %747 = vst [vmem:[%s1270_s4 + $0x118] sm:$0xff] %v960_v39 }
 0x115   :  { %v964_v41 = vpop.eup %963  ;;  %725 = vst [vmem:[%s1270_s4 + $0x68] sm:$0xff] %v962_v40 }
 0x116   :  { %v966_v42 = vpop.eup %965  ;;  %745 = vst [vmem:[%s1270_s4 + $0x108] sm:$0xff] %v964_v41 }
 0x117   :  { %730 = vst [vmem:[%s1270_s4 + $0x90] sm:$0xff] %v966_v42  ;;  %v968_v43 = vpop.eup %967 }
 0x118   :  { %728 = vst [vmem:[%s1270_s4 + $0x80] sm:$0xff] %v968_v43  ;;  %v970_v44 = vpop.eup %969 }
 0x119   :  { %731 = vst [vmem:[%s1270_s4 + $0x98] sm:$0xff] %v970_v44 }
 0x11a   :  { %v972_v45 = vpop.eup %971 }
 0x11b   :  { %729 = vst [vmem:[%s1270_s4 + $0x88] sm:$0xff] %v972_v45 }

</bundles_post_ra>
